<compile_context>
chip_gen: v7x
topology: tpu7x:2x2x1
jax: 0.10.0
libtpu: 0.0.40
codegen_flags: <defaults>
</compile_context>

<pallas_src>
from functools import partial

import jax
import jax.numpy as jnp
from jax import lax
from jax.experimental import pallas as pl
from jax.experimental.pallas import tpu as pltpu

BN_EPS = 1e-5


# ---------------------------------------------------------------------------
# In-kernel helpers (channels on sublanes, flattened row-major H*W on lanes).
# ---------------------------------------------------------------------------
def _conv3x3_lane(x, w_ref, m_cl, m_cr, m_rt, m_rb, W, HW):
    """3x3 'SAME' cross-correlation (zero pad) of x:(Cin,HW) with
    w_ref:(9,Cout,Cin), tap order k = ky*3 + kx (torch layout).

    Factored form:  out = h0 + rowmask(-1)*roll(h(-1), +W)
                            + rowmask(+1)*roll(h(+1), -W)
    where h(dy) = sum_dx W[dy,dx] @ colmasked dx-tap.  Only 4 full-width lane
    rolls per conv and no im2col buffer."""
    t_l = pltpu.roll(x, shift=1, axis=1) * m_cl        # reads col-1 (dx=-1)
    t_c = x                                            # dx = 0
    t_r = pltpu.roll(x, shift=HW - 1, axis=1) * m_cr   # reads col+1 (dx=+1)

    def row_partial(base):
        acc = jnp.dot(w_ref[base + 0], t_l, preferred_element_type=jnp.float32)
        acc = acc + jnp.dot(w_ref[base + 1], t_c, preferred_element_type=jnp.float32)
        acc = acc + jnp.dot(w_ref[base + 2], t_r, preferred_element_type=jnp.float32)
        return acc

    h_m1 = row_partial(0)    # ky = 0 -> dy = -1
    h_0 = row_partial(3)     # ky = 1 -> dy =  0
    h_p1 = row_partial(6)    # ky = 2 -> dy = +1
    return (h_0
            + pltpu.roll(h_m1, shift=W, axis=1) * m_rt
            + pltpu.roll(h_p1, shift=HW - W, axis=1) * m_rb)


def _box_sum_3x3(x, m_cl, m_cr, m_rt, m_rb, W, HW):
    """Separable zero-padded 3x3 box sum of x:(1,HW) (4 rolls)."""
    s = (x + pltpu.roll(x, shift=1, axis=1) * m_cl
         + pltpu.roll(x, shift=HW - 1, axis=1) * m_cr)
    return (s + pltpu.roll(s, shift=W, axis=1) * m_rt
            + pltpu.roll(s, shift=HW - W, axis=1) * m_rb)


# ---------------------------------------------------------------------------
# Stage 1: mask_gene -> gate -> cv 3x3 conv -> / mask_avg, + BN partial stats.
# ---------------------------------------------------------------------------
def _stage1_kernel(x1_ref, bm_ref, wm0_ref, bm0_ref, wm1_ref, bm1_ref, wcv_ref,
                   z_ref, mask_ref, stats_ref, *, H, W, C2):
    HW = H * W
    x1 = x1_ref[0]                     # (C2+1, HW): removal | inpainting | detect
    x = x1[:C2, :]                     # (C2, HW)

    m_cl = bm_ref[0:1, :]              # col >= 1     (valid for dx = -1)
    m_cr = bm_ref[1:2, :]              # col <= W-2   (valid for dx = +1)
    m_rt = bm_ref[2:3, :]              # row >= 1     (valid for dy = -1)
    m_rb = bm_ref[3:4, :]              # row <= H-2   (valid for dy = +1)

    # MASK_GENE: 1x1 conv (+bias) -> ReLU -> 1x1 conv (+bias) -> sigmoid
    h = jnp.maximum(
        jnp.dot(wm0_ref[...], x1, preferred_element_type=jnp.float32) + bm0_ref[...], 0.0)
    mask = jax.nn.sigmoid(
        jnp.dot(wm1_ref[...], h, preferred_element_type=jnp.float32) + bm1_ref[...])

    # cv: 3x3 conv (no bias) of the gated input.
    xc = _conv3x3_lane(x * mask, wcv_ref, m_cl, m_cr, m_rt, m_rb, W, HW)

    # mean_c(avgpool3x3(mask)) == avgpool3x3(mean_c(mask))  (linearity)
    m1 = jnp.mean(mask, axis=0, keepdims=True)                   # (1, HW)
    mask_avg = _box_sum_3x3(m1, m_cl, m_cr, m_rt, m_rb, W, HW) * (1.0 / 9.0)
    mask_avg = jnp.where(mask_avg == 0.0, 1.0, mask_avg)         # mask_avg[==0] = 1
    z = xc * pl.reciprocal(mask_avg, approx=True)                # pre-BN activation

    mask_ref[0] = mask
    z_ref[0] = z.astype(z_ref.dtype)                             # bf16 HBM round trip

    # Per-sample BN partials from the f32 registers (pre bf16 cast):
    # per-channel mean and centered sum of squares (combined exactly in XLA).
    mu = jnp.sum(z, axis=1, keepdims=True) * (1.0 / float(HW))   # (C2, 1)
    d = z - mu
    m2 = jnp.sum(d * d, axis=1, keepdims=True)                   # (C2, 1)
    stats_ref[0] = jnp.concatenate([mu, m2], axis=1)             # (C2, 2)


# ---------------------------------------------------------------------------
# Stage 2: BN affine (precomputed scale/shift) -> ReLU -> 3x3 conv(+bias) -> ReLU.
# ---------------------------------------------------------------------------
def _stage2_kernel(z_ref, bm_ref, scale_ref, shift_ref, wout_ref, bout_ref, o_ref,
                   *, H, W):
    HW = H * W
    z = z_ref[0].astype(jnp.float32)                             # (C2, HW)
    m_cl = bm_ref[0:1, :]
    m_cr = bm_ref[1:2, :]
    m_rt = bm_ref[2:3, :]
    m_rb = bm_ref[3:4, :]

    y = jnp.maximum(z * scale_ref[...] + shift_ref[...], 0.0)    # BN + ReLU
    o = _conv3x3_lane(y, wout_ref, m_cl, m_cr, m_rt, m_rb, W, HW) + bout_ref[...]
    o_ref[0] = jnp.maximum(o, 0.0)                               # ConvNormAct act='relu'


# ---------------------------------------------------------------------------
# Wrapper: NCHW in / NCHW out, two pallas_calls with a parallel grid over B.
# ---------------------------------------------------------------------------
def _full_spec(shape):
    zeros = (0,) * len(shape)
    return pl.BlockSpec(shape, lambda *_: zeros)


def weight_distribution_forward(removal, inpainting, detect, params):
    B, in_ch, H, W = removal.shape
    C2 = 2 * in_ch
    C1 = C2 + 1
    HW = H * W
    Cout = params['w_out'].shape[1]
    f32 = jnp.float32

    x1 = jnp.concatenate([removal, inpainting, detect], axis=1).astype(f32)
    x1 = x1.reshape(B, C1, HW)          # channels on sublanes, spatial on lanes

    # Boundary-validity masks, precomputed once (VMEM-resident via constant
    # index_map): [col>=1, col<=W-2, row>=1, row<=H-2] as f32 multipliers.
    lane = jnp.arange(HW, dtype=jnp.int32)
    row, col = lane // W, lane % W
    bmask = jnp.stack([col >= 1, col <= W - 2, row >= 1, row <= H - 2]).astype(f32)

    vmem_limit = int(min(max(16 * (C1 + 4 + 3 * C2 + Cout) * HW, 32 << 20), 64 << 20))
    cp = pltpu.CompilerParams(dimension_semantics=("parallel",),
                              vmem_limit_bytes=vmem_limit)

    z, mask, stats = pl.pallas_call(
        partial(_stage1_kernel, H=H, W=W, C2=C2),
        grid=(B,),
        in_specs=[
            pl.BlockSpec((1, C1, HW), lambda b: (b, 0, 0)),
            pl.BlockSpec((4, HW), lambda b: (0, 0)),
            _full_spec(params['w_m0'].shape), _full_spec(params['b_m0'].shape),
            _full_spec(params['w_m1'].shape), _full_spec(params['b_m1'].shape),
            _full_spec(params['w_cv'].shape),
        ],
        out_specs=[
            pl.BlockSpec((1, C2, HW), lambda b: (b, 0, 0)),
            pl.BlockSpec((1, C2, HW), lambda b: (b, 0, 0)),
            pl.BlockSpec((1, C2, 2), lambda b: (b, 0, 0)),
        ],
        out_shape=[
            jax.ShapeDtypeStruct((B, C2, HW), jnp.bfloat16),   # z (inter-stage, bf16)
            jax.ShapeDtypeStruct((B, C2, HW), f32),            # mask (module output)
            jax.ShapeDtypeStruct((B, C2, 2), f32),             # per-sample (mean, M2)
        ],
        compiler_params=cp,
    )(x1, bmask, params['w_m0'], params['b_m0'], params['w_m1'], params['b_m1'],
      params['w_cv'])

    # BatchNorm2d(track_running_stats=False): batch statistics (biased var),
    # combined exactly from per-sample mean / centered-M2 (tiny (C2,) math in XLA).
    mu_b = stats[..., 0]                                    # (B, C2)
    m2_b = stats[..., 1]                                    # (B, C2)
    mean = jnp.mean(mu_b, axis=0)                           # (C2,)
    var = (jnp.sum(m2_b, axis=0)
           + HW * jnp.sum((mu_b - mean[None, :]) ** 2, axis=0)) / float(B * HW)
    scale = params['bn_gamma'] * lax.rsqrt(var + BN_EPS)
    shift = params['bn_beta'] - mean * scale
    scale = scale.astype(f32)[:, None]                      # (C2, 1)
    shift = shift.astype(f32)[:, None]                      # (C2, 1)

    out = pl.pallas_call(
        partial(_stage2_kernel, H=H, W=W),
        grid=(B,),
        in_specs=[
            pl.BlockSpec((1, C2, HW), lambda b: (b, 0, 0)),
            pl.BlockSpec((4, HW), lambda b: (0, 0)),
            _full_spec((C2, 1)), _full_spec((C2, 1)),
            _full_spec(params['w_out'].shape), _full_spec(params['b_out'].shape),
        ],
        out_specs=pl.BlockSpec((1, Cout, HW), lambda b: (b, 0, 0)),
        out_shape=jax.ShapeDtypeStruct((B, Cout, HW), f32),
        compiler_params=cp,
    )(z, bmask, scale, shift, params['w_out'], params['b_out'])

    return out.reshape(B, Cout, H, W), mask.reshape(B, C2, H, W)


# ---------------------------------------------------------------------------
# Parameters (torch layout) + conversion to the kernel layout, and a pure-JAX
# reference of the PyTorch forward for validation.
# ---------------------------------------------------------------------------
def init_torch_params(key, in_ch=3, out_ch=3):
    C2 = 2 * in_ch
    C1 = C2 + 1
    ks = jax.random.split(key, 9)
    s = 0.25
    n = jax.random.normal
    return dict(
        w_m0=s * n(ks[0], (C2, C1), jnp.float32), b_m0=s * n(ks[1], (C2,), jnp.float32),
        w_m1=s * n(ks[2], (C2, C2), jnp.float32), b_m1=s * n(ks[3], (C2,), jnp.float32),
        w_cv=s * n(ks[4], (C2, C2, 3, 3), jnp.float32),
        bn_gamma=1.0 + 0.1 * n(ks[5], (C2,), jnp.float32),
        bn_beta=0.1 * n(ks[6], (C2,), jnp.float32),
        w_out=s * n(ks[7], (out_ch, C2, 3, 3), jnp.float32),
        b_out=s * n(ks[8], (out_ch,), jnp.float32),
    )


def to_kernel_params(tp):
    def conv9(w):                     # (O, I, 3, 3) -> (9, O, I), k = ky*3 + kx
        O, I = w.shape[0], w.shape[1]
        return jnp.transpose(w, (2, 3, 0, 1)).reshape(9, O, I)
    return dict(
        w_m0=tp['w_m0'], b_m0=tp['b_m0'][:, None],
        w_m1=tp['w_m1'], b_m1=tp['b_m1'][:, None],
        w_cv=conv9(tp['w_cv']),
        bn_gamma=tp['bn_gamma'], bn_beta=tp['bn_beta'],
        w_out=conv9(tp['w_out']), b_out=tp['b_out'][:, None],
    )


def reference_forward(removal, inpainting, detect, tp):
    hp = lax.Precision.HIGHEST
    dn = ('NCHW', 'OIHW', 'NCHW')
    x1 = jnp.concatenate([removal, inpainting, detect], axis=1)
    x = jnp.concatenate([removal, inpainting], axis=1)
    h = jax.nn.relu(jnp.einsum('oi,bihw->bohw', tp['w_m0'], x1, precision=hp)
                    + tp['b_m0'][None, :, None, None])
    mask = jax.nn.sigmoid(jnp.einsum('oi,bihw->bohw', tp['w_m1'], h, precision=hp)
                          + tp['b_m1'][None, :, None, None])
    xc = lax.conv_general_dilated(x * mask, tp['w_cv'], (1, 1), 'SAME',
                                  dimension_numbers=dn, precision=hp)
    pooled = lax.reduce_window(mask, 0.0, lax.add, (1, 1, 3, 3), (1, 1, 1, 1),
                               'SAME') / 9.0
    mask_avg = jnp.mean(pooled, axis=1, keepdims=True)
    mask_avg = jnp.where(mask_avg == 0.0, 1.0, mask_avg)
    xn = xc / mask_avg
    mean = jnp.mean(xn, axis=(0, 2, 3), keepdims=True)
    var = jnp.mean((xn - mean) ** 2, axis=(0, 2, 3), keepdims=True)
    y = jax.nn.relu((xn - mean) * lax.rsqrt(var + BN_EPS)
                    * tp['bn_gamma'][None, :, None, None]
                    + tp['bn_beta'][None, :, None, None])
    o = lax.conv_general_dilated(y, tp['w_out'], (1, 1), 'SAME',
                                 dimension_numbers=dn, precision=hp)
    o = jax.nn.relu(o + tp['b_out'][None, :, None, None])
    return o, mask


if __name__ == "__main__":
    key = jax.random.PRNGKey(0)
    k1, k2, k3, kp = jax.random.split(key, 4)
    B, in_ch, H, W = 2, 3, 16, 16            # detect is a single-channel map
    removal = jax.random.normal(k1, (B, in_ch, H, W), jnp.float32)
    inpainting = jax.random.normal(k2, (B, in_ch, H, W), jnp.float32)
    detect = jax.random.normal(k3, (B, 1, H, W), jnp.float32)

    tparams = init_torch_params(kp, in_ch=in_ch, out_ch=3)
    kparams = to_kernel_params(tparams)

    fwd = jax.jit(weight_distribution_forward)
    out, mask = fwd(removal, inpainting, detect, kparams)
    jax.block_until_ready((out, mask))

    out_ref, mask_ref = reference_forward(removal, inpainting, detect, tparams)

    assert out.shape == (B, 3, H, W)
    assert mask.shape == (B, 2 * in_ch, H, W)
    assert bool(jnp.all(jnp.isfinite(out))) and bool(jnp.all(jnp.isfinite(mask)))
    # mask is pure f32; out goes through a bf16 inter-stage tensor + approx recip.
    assert float(jnp.max(jnp.abs(mask - mask_ref))) < 5e-3
    assert float(jnp.max(jnp.abs(out - out_ref))) < 6e-2
    print("KERNEL_OK")
</pallas_src>

<mosaic_0001>
module attributes {stable_mosaic.version = 11 : i64} {
  func.func @_stage1_kernel(%arg0: i32, %arg1: memref<1x7x256xf32, #tpu.memory_space<vmem>>, %arg2: memref<4x256xf32, #tpu.memory_space<vmem>>, %arg3: memref<6x7xf32, #tpu.memory_space<vmem>>, %arg4: memref<6x1xf32, #tpu.memory_space<vmem>>, %arg5: memref<6x6xf32, #tpu.memory_space<vmem>>, %arg6: memref<6x1xf32, #tpu.memory_space<vmem>>, %arg7: memref<9x6x6xf32, #tpu.memory_space<vmem>>, %arg8: memref<1x6x256xbf16, #tpu.memory_space<vmem>>, %arg9: memref<1x6x256xf32, #tpu.memory_space<vmem>>, %arg10: memref<1x6x2xf32, #tpu.memory_space<vmem>>) attributes {dimension_semantics = [#tpu.dimension_semantics<parallel>], iteration_bounds = array<i64: 2>, scalar_prefetch = 0 : i64, scratch_operands = 0 : i64, tpu.core_type = #tpu.core_type<tc>, window_params = [{transform_indices = @transform_0, window_bounds = array<i64: 1, 7, 256>}, {pipeline_mode = #tpu.pipeline_mode<synchronous>, transform_indices = @transform_1, window_bounds = array<i64: 4, 256>}, {pipeline_mode = #tpu.pipeline_mode<synchronous>, transform_indices = @transform_2, window_bounds = array<i64: 6, 7>}, {pipeline_mode = #tpu.pipeline_mode<synchronous>, transform_indices = @transform_3, window_bounds = array<i64: 6, 1>}, {pipeline_mode = #tpu.pipeline_mode<synchronous>, transform_indices = @transform_4, window_bounds = array<i64: 6, 6>}, {pipeline_mode = #tpu.pipeline_mode<synchronous>, transform_indices = @transform_5, window_bounds = array<i64: 6, 1>}, {pipeline_mode = #tpu.pipeline_mode<synchronous>, transform_indices = @transform_6, window_bounds = array<i64: 9, 6, 6>}, {transform_indices = @transform_7, window_bounds = array<i64: 1, 6, 256>}, {transform_indices = @transform_8, window_bounds = array<i64: 1, 6, 256>}, {transform_indices = @transform_9, window_bounds = array<i64: 1, 6, 2>}]} {
    %c0 = arith.constant 0 : index
    %c0_0 = arith.constant 0 : index
    %c0_1 = arith.constant 0 : index
    %0 = vector.load %arg1[%c0, %c0_0, %c0_1] : memref<1x7x256xf32, #tpu.memory_space<vmem>>, vector<1x7x256xf32>
    %1 = vector.shape_cast %0 : vector<1x7x256xf32> to vector<7x256xf32>
    %2 = vector.extract_strided_slice %1 {offsets = [0, 0], sizes = [6, 256], strides = [1, 1]} : vector<7x256xf32> to vector<6x256xf32>
    %c0_2 = arith.constant 0 : index
    %c0_3 = arith.constant 0 : index
    %3 = vector.load %arg2[%c0_2, %c0_3] : memref<4x256xf32, #tpu.memory_space<vmem>>, vector<1x256xf32>
    %c1 = arith.constant 1 : index
    %c0_4 = arith.constant 0 : index
    %4 = vector.load %arg2[%c1, %c0_4] : memref<4x256xf32, #tpu.memory_space<vmem>>, vector<1x256xf32>
    %c2 = arith.constant 2 : index
    %c0_5 = arith.constant 0 : index
    %5 = vector.load %arg2[%c2, %c0_5] : memref<4x256xf32, #tpu.memory_space<vmem>>, vector<1x256xf32>
    %c3 = arith.constant 3 : index
    %c0_6 = arith.constant 0 : index
    %6 = vector.load %arg2[%c3, %c0_6] : memref<4x256xf32, #tpu.memory_space<vmem>>, vector<1x256xf32>
    %c0_7 = arith.constant 0 : index
    %c0_8 = arith.constant 0 : index
    %7 = vector.load %arg3[%c0_7, %c0_8] : memref<6x7xf32, #tpu.memory_space<vmem>>, vector<6x7xf32>
    %cst = arith.constant dense<0.000000e+00> : vector<6x256xf32>
    %8 = tpu.matmul %7, %1, %cst {dimension_numbers = #tpu.dot_dimension_numbers<[1], [0], [0], [1], [0, 0, 1, 1], [], []>} : vector<6x7xf32>, vector<7x256xf32>, vector<6x256xf32> -> vector<6x256xf32>
    %c0_9 = arith.constant 0 : index
    %c0_10 = arith.constant 0 : index
    %9 = vector.load %arg4[%c0_9, %c0_10] : memref<6x1xf32, #tpu.memory_space<vmem>>, vector<6x1xf32>
    %10 = vector.broadcast %9 : vector<6x1xf32> to vector<6x256xf32>
    %11 = arith.addf %8, %10 : vector<6x256xf32>
    %cst_11 = arith.constant 0.000000e+00 : f32
    %12 = vector.broadcast %cst_11 : f32 to vector<6x256xf32>
    %13 = arith.maximumf %11, %12 : vector<6x256xf32>
    %c0_12 = arith.constant 0 : index
    %c0_13 = arith.constant 0 : index
    %14 = vector.load %arg5[%c0_12, %c0_13] : memref<6x6xf32, #tpu.memory_space<vmem>>, vector<6x6xf32>
    %cst_14 = arith.constant dense<0.000000e+00> : vector<6x256xf32>
    %15 = tpu.matmul %14, %13, %cst_14 {dimension_numbers = #tpu.dot_dimension_numbers<[1], [0], [0], [1], [0, 0, 1, 1], [], []>} : vector<6x6xf32>, vector<6x256xf32>, vector<6x256xf32> -> vector<6x256xf32>
    %c0_15 = arith.constant 0 : index
    %c0_16 = arith.constant 0 : index
    %16 = vector.load %arg6[%c0_15, %c0_16] : memref<6x1xf32, #tpu.memory_space<vmem>>, vector<6x1xf32>
    %17 = vector.broadcast %16 : vector<6x1xf32> to vector<6x256xf32>
    %18 = arith.addf %15, %17 : vector<6x256xf32>
    %19 = arith.negf %18 : vector<6x256xf32>
    %20 = math.exp %19 : vector<6x256xf32>
    %cst_17 = arith.constant 1.000000e+00 : f32
    %21 = vector.broadcast %cst_17 : f32 to vector<6x256xf32>
    %22 = arith.addf %21, %20 : vector<6x256xf32>
    %23 = arith.divf %21, %22 : vector<6x256xf32>
    %24 = arith.mulf %2, %23 : vector<6x256xf32>
    %c1_i32 = arith.constant 1 : i32
    %25 = tpu.dynamic_rotate %24 by %c1_i32 dim 1 : vector<6x256xf32>, i32 -> vector<6x256xf32>
    %26 = vector.broadcast %3 : vector<1x256xf32> to vector<6x256xf32>
    %27 = arith.mulf %25, %26 : vector<6x256xf32>
    %c255_i32 = arith.constant 255 : i32
    %28 = tpu.dynamic_rotate %24 by %c255_i32 dim 1 : vector<6x256xf32>, i32 -> vector<6x256xf32>
    %29 = vector.broadcast %4 : vector<1x256xf32> to vector<6x256xf32>
    %30 = arith.mulf %28, %29 : vector<6x256xf32>
    %c0_18 = arith.constant 0 : index
    %c0_19 = arith.constant 0 : index
    %c0_20 = arith.constant 0 : index
    %31 = vector.load %arg7[%c0_18, %c0_19, %c0_20] : memref<9x6x6xf32, #tpu.memory_space<vmem>>, vector<1x6x6xf32>
    %32 = vector.shape_cast %31 : vector<1x6x6xf32> to vector<6x6xf32>
    %cst_21 = arith.constant dense<0.000000e+00> : vector<6x256xf32>
    %33 = tpu.matmul %32, %27, %cst_21 {dimension_numbers = #tpu.dot_dimension_numbers<[1], [0], [0], [1], [0, 0, 1, 1], [], []>} : vector<6x6xf32>, vector<6x256xf32>, vector<6x256xf32> -> vector<6x256xf32>
    %c1_22 = arith.constant 1 : index
    %c0_23 = arith.constant 0 : index
    %c0_24 = arith.constant 0 : index
    %34 = vector.load %arg7[%c1_22, %c0_23, %c0_24] : memref<9x6x6xf32, #tpu.memory_space<vmem>>, vector<1x6x6xf32>
    %35 = vector.shape_cast %34 : vector<1x6x6xf32> to vector<6x6xf32>
    %cst_25 = arith.constant dense<0.000000e+00> : vector<6x256xf32>
    %36 = tpu.matmul %35, %24, %cst_25 {dimension_numbers = #tpu.dot_dimension_numbers<[1], [0], [0], [1], [0, 0, 1, 1], [], []>} : vector<6x6xf32>, vector<6x256xf32>, vector<6x256xf32> -> vector<6x256xf32>
    %37 = arith.addf %33, %36 : vector<6x256xf32>
    %c2_26 = arith.constant 2 : index
    %c0_27 = arith.constant 0 : index
    %c0_28 = arith.constant 0 : index
    %38 = vector.load %arg7[%c2_26, %c0_27, %c0_28] : memref<9x6x6xf32, #tpu.memory_space<vmem>>, vector<1x6x6xf32>
    %39 = vector.shape_cast %38 : vector<1x6x6xf32> to vector<6x6xf32>
    %cst_29 = arith.constant dense<0.000000e+00> : vector<6x256xf32>
    %40 = tpu.matmul %39, %30, %cst_29 {dimension_numbers = #tpu.dot_dimension_numbers<[1], [0], [0], [1], [0, 0, 1, 1], [], []>} : vector<6x6xf32>, vector<6x256xf32>, vector<6x256xf32> -> vector<6x256xf32>
    %41 = arith.addf %37, %40 : vector<6x256xf32>
    %c3_30 = arith.constant 3 : index
    %c0_31 = arith.constant 0 : index
    %c0_32 = arith.constant 0 : index
    %42 = vector.load %arg7[%c3_30, %c0_31, %c0_32] : memref<9x6x6xf32, #tpu.memory_space<vmem>>, vector<1x6x6xf32>
    %43 = vector.shape_cast %42 : vector<1x6x6xf32> to vector<6x6xf32>
    %cst_33 = arith.constant dense<0.000000e+00> : vector<6x256xf32>
    %44 = tpu.matmul %43, %27, %cst_33 {dimension_numbers = #tpu.dot_dimension_numbers<[1], [0], [0], [1], [0, 0, 1, 1], [], []>} : vector<6x6xf32>, vector<6x256xf32>, vector<6x256xf32> -> vector<6x256xf32>
    %c4 = arith.constant 4 : index
    %c0_34 = arith.constant 0 : index
    %c0_35 = arith.constant 0 : index
    %45 = vector.load %arg7[%c4, %c0_34, %c0_35] : memref<9x6x6xf32, #tpu.memory_space<vmem>>, vector<1x6x6xf32>
    %46 = vector.shape_cast %45 : vector<1x6x6xf32> to vector<6x6xf32>
    %cst_36 = arith.constant dense<0.000000e+00> : vector<6x256xf32>
    %47 = tpu.matmul %46, %24, %cst_36 {dimension_numbers = #tpu.dot_dimension_numbers<[1], [0], [0], [1], [0, 0, 1, 1], [], []>} : vector<6x6xf32>, vector<6x256xf32>, vector<6x256xf32> -> vector<6x256xf32>
    %48 = arith.addf %44, %47 : vector<6x256xf32>
    %c5 = arith.constant 5 : index
    %c0_37 = arith.constant 0 : index
    %c0_38 = arith.constant 0 : index
    %49 = vector.load %arg7[%c5, %c0_37, %c0_38] : memref<9x6x6xf32, #tpu.memory_space<vmem>>, vector<1x6x6xf32>
    %50 = vector.shape_cast %49 : vector<1x6x6xf32> to vector<6x6xf32>
    %cst_39 = arith.constant dense<0.000000e+00> : vector<6x256xf32>
    %51 = tpu.matmul %50, %30, %cst_39 {dimension_numbers = #tpu.dot_dimension_numbers<[1], [0], [0], [1], [0, 0, 1, 1], [], []>} : vector<6x6xf32>, vector<6x256xf32>, vector<6x256xf32> -> vector<6x256xf32>
    %52 = arith.addf %48, %51 : vector<6x256xf32>
    %c6 = arith.constant 6 : index
    %c0_40 = arith.constant 0 : index
    %c0_41 = arith.constant 0 : index
    %53 = vector.load %arg7[%c6, %c0_40, %c0_41] : memref<9x6x6xf32, #tpu.memory_space<vmem>>, vector<1x6x6xf32>
    %54 = vector.shape_cast %53 : vector<1x6x6xf32> to vector<6x6xf32>
    %cst_42 = arith.constant dense<0.000000e+00> : vector<6x256xf32>
    %55 = tpu.matmul %54, %27, %cst_42 {dimension_numbers = #tpu.dot_dimension_numbers<[1], [0], [0], [1], [0, 0, 1, 1], [], []>} : vector<6x6xf32>, vector<6x256xf32>, vector<6x256xf32> -> vector<6x256xf32>
    %c7 = arith.constant 7 : index
    %c0_43 = arith.constant 0 : index
    %c0_44 = arith.constant 0 : index
    %56 = vector.load %arg7[%c7, %c0_43, %c0_44] : memref<9x6x6xf32, #tpu.memory_space<vmem>>, vector<1x6x6xf32>
    %57 = vector.shape_cast %56 : vector<1x6x6xf32> to vector<6x6xf32>
    %cst_45 = arith.constant dense<0.000000e+00> : vector<6x256xf32>
    %58 = tpu.matmul %57, %24, %cst_45 {dimension_numbers = #tpu.dot_dimension_numbers<[1], [0], [0], [1], [0, 0, 1, 1], [], []>} : vector<6x6xf32>, vector<6x256xf32>, vector<6x256xf32> -> vector<6x256xf32>
    %59 = arith.addf %55, %58 : vector<6x256xf32>
    %c8 = arith.constant 8 : index
    %c0_46 = arith.constant 0 : index
    %c0_47 = arith.constant 0 : index
    %60 = vector.load %arg7[%c8, %c0_46, %c0_47] : memref<9x6x6xf32, #tpu.memory_space<vmem>>, vector<1x6x6xf32>
    %61 = vector.shape_cast %60 : vector<1x6x6xf32> to vector<6x6xf32>
    %cst_48 = arith.constant dense<0.000000e+00> : vector<6x256xf32>
    %62 = tpu.matmul %61, %30, %cst_48 {dimension_numbers = #tpu.dot_dimension_numbers<[1], [0], [0], [1], [0, 0, 1, 1], [], []>} : vector<6x6xf32>, vector<6x256xf32>, vector<6x256xf32> -> vector<6x256xf32>
    %63 = arith.addf %59, %62 : vector<6x256xf32>
    %c16_i32 = arith.constant 16 : i32
    %64 = tpu.dynamic_rotate %41 by %c16_i32 dim 1 : vector<6x256xf32>, i32 -> vector<6x256xf32>
    %65 = vector.broadcast %5 : vector<1x256xf32> to vector<6x256xf32>
    %66 = arith.mulf %64, %65 : vector<6x256xf32>
    %67 = arith.addf %52, %66 : vector<6x256xf32>
    %c240_i32 = arith.constant 240 : i32
    %68 = tpu.dynamic_rotate %63 by %c240_i32 dim 1 : vector<6x256xf32>, i32 -> vector<6x256xf32>
    %69 = vector.broadcast %6 : vector<1x256xf32> to vector<6x256xf32>
    %70 = arith.mulf %68, %69 : vector<6x256xf32>
    %71 = arith.addf %67, %70 : vector<6x256xf32>
    %cst_49 = arith.constant dense<0.000000e+00> : vector<256xf32>
    %72 = vector.multi_reduction <add>, %23, %cst_49 [0] : vector<6x256xf32> to vector<256xf32>
    %73 = vector.shape_cast %72 : vector<256xf32> to vector<1x256xf32>
    %cst_50 = arith.constant 6.000000e+00 : f32
    %74 = vector.broadcast %cst_50 : f32 to vector<1x256xf32>
    %75 = arith.divf %73, %74 : vector<1x256xf32>
    %c1_i32_51 = arith.constant 1 : i32
    %76 = tpu.dynamic_rotate %75 by %c1_i32_51 dim 1 : vector<1x256xf32>, i32 -> vector<1x256xf32>
    %77 = arith.mulf %76, %3 : vector<1x256xf32>
    %78 = arith.addf %75, %77 : vector<1x256xf32>
    %c255_i32_52 = arith.constant 255 : i32
    %79 = tpu.dynamic_rotate %75 by %c255_i32_52 dim 1 : vector<1x256xf32>, i32 -> vector<1x256xf32>
    %80 = arith.mulf %79, %4 : vector<1x256xf32>
    %81 = arith.addf %78, %80 : vector<1x256xf32>
    %c16_i32_53 = arith.constant 16 : i32
    %82 = tpu.dynamic_rotate %81 by %c16_i32_53 dim 1 : vector<1x256xf32>, i32 -> vector<1x256xf32>
    %83 = arith.mulf %82, %5 : vector<1x256xf32>
    %84 = arith.addf %81, %83 : vector<1x256xf32>
    %c240_i32_54 = arith.constant 240 : i32
    %85 = tpu.dynamic_rotate %81 by %c240_i32_54 dim 1 : vector<1x256xf32>, i32 -> vector<1x256xf32>
    %86 = arith.mulf %85, %6 : vector<1x256xf32>
    %87 = arith.addf %84, %86 : vector<1x256xf32>
    %cst_55 = arith.constant 0.111111112 : f32
    %88 = vector.broadcast %cst_55 : f32 to vector<1x256xf32>
    %89 = arith.mulf %87, %88 : vector<1x256xf32>
    %cst_56 = arith.constant 0.000000e+00 : f32
    %90 = vector.broadcast %cst_56 : f32 to vector<1x256xf32>
    %91 = arith.cmpf oeq, %89, %90 : vector<1x256xf32>
    %cst_57 = arith.constant 1.000000e+00 : f32
    %92 = vector.broadcast %cst_57 : f32 to vector<1x256xf32>
    %93 = arith.select %91, %92, %89 : vector<1x256xi1>, vector<1x256xf32>
    %94 = tpu.reciprocal %93 {approx = true} : vector<1x256xf32> -> vector<1x256xf32>
    %95 = vector.broadcast %94 : vector<1x256xf32> to vector<6x256xf32>
    %96 = arith.mulf %71, %95 : vector<6x256xf32>
    %c0_58 = arith.constant 0 : index
    %c0_59 = arith.constant 0 : index
    %c0_60 = arith.constant 0 : index
    %97 = vector.load %arg9[%c0_58, %c0_59, %c0_60] : memref<1x6x256xf32, #tpu.memory_space<vmem>>, vector<1x6x256xf32>
    %98 = vector.shape_cast %97 : vector<1x6x256xf32> to vector<6x256xf32>
    %99 = vector.shape_cast %23 : vector<6x256xf32> to vector<1x6x256xf32>
    tpu.vector_store %arg9[%c0_58, %c0_59, %c0_60], %99 {strides = array<i32>} : memref<1x6x256xf32, #tpu.memory_space<vmem>>, vector<1x6x256xf32>,
    %100 = arith.truncf %96 : vector<6x256xf32> to vector<6x256xbf16>
    %c0_61 = arith.constant 0 : index
    %c0_62 = arith.constant 0 : index
    %c0_63 = arith.constant 0 : index
    %101 = vector.load %arg8[%c0_61, %c0_62, %c0_63] : memref<1x6x256xbf16, #tpu.memory_space<vmem>>, vector<1x6x256xbf16>
    %102 = vector.shape_cast %101 : vector<1x6x256xbf16> to vector<6x256xbf16>
    %103 = vector.shape_cast %100 : vector<6x256xbf16> to vector<1x6x256xbf16>
    tpu.vector_store %arg8[%c0_61, %c0_62, %c0_63], %103 {strides = array<i32>} : memref<1x6x256xbf16, #tpu.memory_space<vmem>>, vector<1x6x256xbf16>,
    %cst_64 = arith.constant dense<0.000000e+00> : vector<6xf32>
    %104 = vector.multi_reduction <add>, %96, %cst_64 [1] : vector<6x256xf32> to vector<6xf32>
    %105 = vector.shape_cast %104 : vector<6xf32> to vector<6x1xf32>
    %cst_65 = arith.constant 3.906250e-03 : f32
    %106 = vector.broadcast %cst_65 : f32 to vector<6x1xf32>
    %107 = arith.mulf %105, %106 : vector<6x1xf32>
    %108 = vector.broadcast %107 : vector<6x1xf32> to vector<6x256xf32>
    %109 = arith.subf %96, %108 : vector<6x256xf32>
    %110 = arith.mulf %109, %109 : vector<6x256xf32>
    %cst_66 = arith.constant dense<0.000000e+00> : vector<6xf32>
    %111 = vector.multi_reduction <add>, %110, %cst_66 [1] : vector<6x256xf32> to vector<6xf32>
    %112 = vector.shape_cast %111 : vector<6xf32> to vector<6x1xf32>
    %113 = tpu.concatenate %107, %112 in 1 : vector<6x1xf32>, vector<6x1xf32> -> vector<6x2xf32>
    %c0_67 = arith.constant 0 : index
    %c0_68 = arith.constant 0 : index
    %c0_69 = arith.constant 0 : index
    %114 = vector.load %arg10[%c0_67, %c0_68, %c0_69] : memref<1x6x2xf32, #tpu.memory_space<vmem>>, vector<1x6x2xf32>
    %115 = vector.shape_cast %114 : vector<1x6x2xf32> to vector<6x2xf32>
    %116 = vector.shape_cast %113 : vector<6x2xf32> to vector<1x6x2xf32>
    tpu.vector_store %arg10[%c0_67, %c0_68, %c0_69], %116 {strides = array<i32>} : memref<1x6x2xf32, #tpu.memory_space<vmem>>, vector<1x6x2xf32>,
    return
  }
  func.func @transform_0(%arg0: i32) -> (i32, i32, i32) {
    %c0_i32 = arith.constant 0 : i32
    %c0_i32_0 = arith.constant 0 : i32
    %c0_i32_1 = arith.constant 0 : i32
    return %arg0, %c0_i32, %c0_i32_0 : i32, i32, i32
  }
  func.func @transform_1(%arg0: i32) -> (i32, i32) {
    %c0_i32 = arith.constant 0 : i32
    %c0_i32_0 = arith.constant 0 : i32
    %c0_i32_1 = arith.constant 0 : i32
    return %c0_i32, %c0_i32_0 : i32, i32
  }
  func.func @transform_2(%arg0: i32) -> (i32, i32) {
    %c0_i32 = arith.constant 0 : i32
    %c0_i32_0 = arith.constant 0 : i32
    %c0_i32_1 = arith.constant 0 : i32
    return %c0_i32, %c0_i32_0 : i32, i32
  }
  func.func @transform_3(%arg0: i32) -> (i32, i32) {
    %c0_i32 = arith.constant 0 : i32
    %c0_i32_0 = arith.constant 0 : i32
    %c0_i32_1 = arith.constant 0 : i32
    return %c0_i32, %c0_i32_0 : i32, i32
  }
  func.func @transform_4(%arg0: i32) -> (i32, i32) {
    %c0_i32 = arith.constant 0 : i32
    %c0_i32_0 = arith.constant 0 : i32
    %c0_i32_1 = arith.constant 0 : i32
    return %c0_i32, %c0_i32_0 : i32, i32
  }
  func.func @transform_5(%arg0: i32) -> (i32, i32) {
    %c0_i32 = arith.constant 0 : i32
    %c0_i32_0 = arith.constant 0 : i32
    %c0_i32_1 = arith.constant 0 : i32
    return %c0_i32, %c0_i32_0 : i32, i32
  }
  func.func @transform_6(%arg0: i32) -> (i32, i32, i32) {
    %c0_i32 = arith.constant 0 : i32
    %c0_i32_0 = arith.constant 0 : i32
    %c0_i32_1 = arith.constant 0 : i32
    %c0_i32_2 = arith.constant 0 : i32
    return %c0_i32, %c0_i32_0, %c0_i32_1 : i32, i32, i32
  }
  func.func @transform_7(%arg0: i32) -> (i32, i32, i32) {
    %c0_i32 = arith.constant 0 : i32
    %c0_i32_0 = arith.constant 0 : i32
    %c0_i32_1 = arith.constant 0 : i32
    return %arg0, %c0_i32, %c0_i32_0 : i32, i32, i32
  }
  func.func @transform_8(%arg0: i32) -> (i32, i32, i32) {
    %c0_i32 = arith.constant 0 : i32
    %c0_i32_0 = arith.constant 0 : i32
    %c0_i32_1 = arith.constant 0 : i32
    return %arg0, %c0_i32, %c0_i32_0 : i32, i32, i32
  }
  func.func @transform_9(%arg0: i32) -> (i32, i32, i32) {
    %c0_i32 = arith.constant 0 : i32
    %c0_i32_0 = arith.constant 0 : i32
    %c0_i32_1 = arith.constant 0 : i32
    return %arg0, %c0_i32, %c0_i32_0 : i32, i32, i32
  }
}

module attributes {stable_mosaic.version = 11 : i64} {
  func.func @_stage2_kernel(%arg0: i32, %arg1: memref<1x6x256xbf16, #tpu.memory_space<vmem>>, %arg2: memref<4x256xf32, #tpu.memory_space<vmem>>, %arg3: memref<6x1xf32, #tpu.memory_space<vmem>>, %arg4: memref<6x1xf32, #tpu.memory_space<vmem>>, %arg5: memref<9x3x6xf32, #tpu.memory_space<vmem>>, %arg6: memref<3x1xf32, #tpu.memory_space<vmem>>, %arg7: memref<1x3x256xf32, #tpu.memory_space<vmem>>) attributes {dimension_semantics = [#tpu.dimension_semantics<parallel>], iteration_bounds = array<i64: 2>, scalar_prefetch = 0 : i64, scratch_operands = 0 : i64, tpu.core_type = #tpu.core_type<tc>, window_params = [{transform_indices = @transform_0, window_bounds = array<i64: 1, 6, 256>}, {pipeline_mode = #tpu.pipeline_mode<synchronous>, transform_indices = @transform_1, window_bounds = array<i64: 4, 256>}, {pipeline_mode = #tpu.pipeline_mode<synchronous>, transform_indices = @transform_2, window_bounds = array<i64: 6, 1>}, {pipeline_mode = #tpu.pipeline_mode<synchronous>, transform_indices = @transform_3, window_bounds = array<i64: 6, 1>}, {pipeline_mode = #tpu.pipeline_mode<synchronous>, transform_indices = @transform_4, window_bounds = array<i64: 9, 3, 6>}, {pipeline_mode = #tpu.pipeline_mode<synchronous>, transform_indices = @transform_5, window_bounds = array<i64: 3, 1>}, {transform_indices = @transform_6, window_bounds = array<i64: 1, 3, 256>}]} {
    %c0 = arith.constant 0 : index
    %c0_0 = arith.constant 0 : index
    %c0_1 = arith.constant 0 : index
    %0 = vector.load %arg1[%c0, %c0_0, %c0_1] : memref<1x6x256xbf16, #tpu.memory_space<vmem>>, vector<1x6x256xbf16>
    %1 = vector.shape_cast %0 : vector<1x6x256xbf16> to vector<6x256xbf16>
    %2 = arith.extf %1 : vector<6x256xbf16> to vector<6x256xf32>
    %c0_2 = arith.constant 0 : index
    %c0_3 = arith.constant 0 : index
    %3 = vector.load %arg2[%c0_2, %c0_3] : memref<4x256xf32, #tpu.memory_space<vmem>>, vector<1x256xf32>
    %c1 = arith.constant 1 : index
    %c0_4 = arith.constant 0 : index
    %4 = vector.load %arg2[%c1, %c0_4] : memref<4x256xf32, #tpu.memory_space<vmem>>, vector<1x256xf32>
    %c2 = arith.constant 2 : index
    %c0_5 = arith.constant 0 : index
    %5 = vector.load %arg2[%c2, %c0_5] : memref<4x256xf32, #tpu.memory_space<vmem>>, vector<1x256xf32>
    %c3 = arith.constant 3 : index
    %c0_6 = arith.constant 0 : index
    %6 = vector.load %arg2[%c3, %c0_6] : memref<4x256xf32, #tpu.memory_space<vmem>>, vector<1x256xf32>
    %c0_7 = arith.constant 0 : index
    %c0_8 = arith.constant 0 : index
    %7 = vector.load %arg3[%c0_7, %c0_8] : memref<6x1xf32, #tpu.memory_space<vmem>>, vector<6x1xf32>
    %8 = vector.broadcast %7 : vector<6x1xf32> to vector<6x256xf32>
    %9 = arith.mulf %2, %8 : vector<6x256xf32>
    %c0_9 = arith.constant 0 : index
    %c0_10 = arith.constant 0 : index
    %10 = vector.load %arg4[%c0_9, %c0_10] : memref<6x1xf32, #tpu.memory_space<vmem>>, vector<6x1xf32>
    %11 = vector.broadcast %10 : vector<6x1xf32> to vector<6x256xf32>
    %12 = arith.addf %9, %11 : vector<6x256xf32>
    %cst = arith.constant 0.000000e+00 : f32
    %13 = vector.broadcast %cst : f32 to vector<6x256xf32>
    %14 = arith.maximumf %12, %13 : vector<6x256xf32>
    %c1_i32 = arith.constant 1 : i32
    %15 = tpu.dynamic_rotate %14 by %c1_i32 dim 1 : vector<6x256xf32>, i32 -> vector<6x256xf32>
    %16 = vector.broadcast %3 : vector<1x256xf32> to vector<6x256xf32>
    %17 = arith.mulf %15, %16 : vector<6x256xf32>
    %c255_i32 = arith.constant 255 : i32
    %18 = tpu.dynamic_rotate %14 by %c255_i32 dim 1 : vector<6x256xf32>, i32 -> vector<6x256xf32>
    %19 = vector.broadcast %4 : vector<1x256xf32> to vector<6x256xf32>
    %20 = arith.mulf %18, %19 : vector<6x256xf32>
    %c0_11 = arith.constant 0 : index
    %c0_12 = arith.constant 0 : index
    %c0_13 = arith.constant 0 : index
    %21 = vector.load %arg5[%c0_11, %c0_12, %c0_13] : memref<9x3x6xf32, #tpu.memory_space<vmem>>, vector<1x3x6xf32>
    %22 = vector.shape_cast %21 : vector<1x3x6xf32> to vector<3x6xf32>
    %cst_14 = arith.constant dense<0.000000e+00> : vector<3x256xf32>
    %23 = tpu.matmul %22, %17, %cst_14 {dimension_numbers = #tpu.dot_dimension_numbers<[1], [0], [0], [1], [0, 0, 1, 1], [], []>} : vector<3x6xf32>, vector<6x256xf32>, vector<3x256xf32> -> vector<3x256xf32>
    %c1_15 = arith.constant 1 : index
    %c0_16 = arith.constant 0 : index
    %c0_17 = arith.constant 0 : index
    %24 = vector.load %arg5[%c1_15, %c0_16, %c0_17] : memref<9x3x6xf32, #tpu.memory_space<vmem>>, vector<1x3x6xf32>
    %25 = vector.shape_cast %24 : vector<1x3x6xf32> to vector<3x6xf32>
    %cst_18 = arith.constant dense<0.000000e+00> : vector<3x256xf32>
    %26 = tpu.matmul %25, %14, %cst_18 {dimension_numbers = #tpu.dot_dimension_numbers<[1], [0], [0], [1], [0, 0, 1, 1], [], []>} : vector<3x6xf32>, vector<6x256xf32>, vector<3x256xf32> -> vector<3x256xf32>
    %27 = arith.addf %23, %26 : vector<3x256xf32>
    %c2_19 = arith.constant 2 : index
    %c0_20 = arith.constant 0 : index
    %c0_21 = arith.constant 0 : index
    %28 = vector.load %arg5[%c2_19, %c0_20, %c0_21] : memref<9x3x6xf32, #tpu.memory_space<vmem>>, vector<1x3x6xf32>
    %29 = vector.shape_cast %28 : vector<1x3x6xf32> to vector<3x6xf32>
    %cst_22 = arith.constant dense<0.000000e+00> : vector<3x256xf32>
    %30 = tpu.matmul %29, %20, %cst_22 {dimension_numbers = #tpu.dot_dimension_numbers<[1], [0], [0], [1], [0, 0, 1, 1], [], []>} : vector<3x6xf32>, vector<6x256xf32>, vector<3x256xf32> -> vector<3x256xf32>
    %31 = arith.addf %27, %30 : vector<3x256xf32>
    %c3_23 = arith.constant 3 : index
    %c0_24 = arith.constant 0 : index
    %c0_25 = arith.constant 0 : index
    %32 = vector.load %arg5[%c3_23, %c0_24, %c0_25] : memref<9x3x6xf32, #tpu.memory_space<vmem>>, vector<1x3x6xf32>
    %33 = vector.shape_cast %32 : vector<1x3x6xf32> to vector<3x6xf32>
    %cst_26 = arith.constant dense<0.000000e+00> : vector<3x256xf32>
    %34 = tpu.matmul %33, %17, %cst_26 {dimension_numbers = #tpu.dot_dimension_numbers<[1], [0], [0], [1], [0, 0, 1, 1], [], []>} : vector<3x6xf32>, vector<6x256xf32>, vector<3x256xf32> -> vector<3x256xf32>
    %c4 = arith.constant 4 : index
    %c0_27 = arith.constant 0 : index
    %c0_28 = arith.constant 0 : index
    %35 = vector.load %arg5[%c4, %c0_27, %c0_28] : memref<9x3x6xf32, #tpu.memory_space<vmem>>, vector<1x3x6xf32>
    %36 = vector.shape_cast %35 : vector<1x3x6xf32> to vector<3x6xf32>
    %cst_29 = arith.constant dense<0.000000e+00> : vector<3x256xf32>
    %37 = tpu.matmul %36, %14, %cst_29 {dimension_numbers = #tpu.dot_dimension_numbers<[1], [0], [0], [1], [0, 0, 1, 1], [], []>} : vector<3x6xf32>, vector<6x256xf32>, vector<3x256xf32> -> vector<3x256xf32>
    %38 = arith.addf %34, %37 : vector<3x256xf32>
    %c5 = arith.constant 5 : index
    %c0_30 = arith.constant 0 : index
    %c0_31 = arith.constant 0 : index
    %39 = vector.load %arg5[%c5, %c0_30, %c0_31] : memref<9x3x6xf32, #tpu.memory_space<vmem>>, vector<1x3x6xf32>
    %40 = vector.shape_cast %39 : vector<1x3x6xf32> to vector<3x6xf32>
    %cst_32 = arith.constant dense<0.000000e+00> : vector<3x256xf32>
    %41 = tpu.matmul %40, %20, %cst_32 {dimension_numbers = #tpu.dot_dimension_numbers<[1], [0], [0], [1], [0, 0, 1, 1], [], []>} : vector<3x6xf32>, vector<6x256xf32>, vector<3x256xf32> -> vector<3x256xf32>
    %42 = arith.addf %38, %41 : vector<3x256xf32>
    %c6 = arith.constant 6 : index
    %c0_33 = arith.constant 0 : index
    %c0_34 = arith.constant 0 : index
    %43 = vector.load %arg5[%c6, %c0_33, %c0_34] : memref<9x3x6xf32, #tpu.memory_space<vmem>>, vector<1x3x6xf32>
    %44 = vector.shape_cast %43 : vector<1x3x6xf32> to vector<3x6xf32>
    %cst_35 = arith.constant dense<0.000000e+00> : vector<3x256xf32>
    %45 = tpu.matmul %44, %17, %cst_35 {dimension_numbers = #tpu.dot_dimension_numbers<[1], [0], [0], [1], [0, 0, 1, 1], [], []>} : vector<3x6xf32>, vector<6x256xf32>, vector<3x256xf32> -> vector<3x256xf32>
    %c7 = arith.constant 7 : index
    %c0_36 = arith.constant 0 : index
    %c0_37 = arith.constant 0 : index
    %46 = vector.load %arg5[%c7, %c0_36, %c0_37] : memref<9x3x6xf32, #tpu.memory_space<vmem>>, vector<1x3x6xf32>
    %47 = vector.shape_cast %46 : vector<1x3x6xf32> to vector<3x6xf32>
    %cst_38 = arith.constant dense<0.000000e+00> : vector<3x256xf32>
    %48 = tpu.matmul %47, %14, %cst_38 {dimension_numbers = #tpu.dot_dimension_numbers<[1], [0], [0], [1], [0, 0, 1, 1], [], []>} : vector<3x6xf32>, vector<6x256xf32>, vector<3x256xf32> -> vector<3x256xf32>
    %49 = arith.addf %45, %48 : vector<3x256xf32>
    %c8 = arith.constant 8 : index
    %c0_39 = arith.constant 0 : index
    %c0_40 = arith.constant 0 : index
    %50 = vector.load %arg5[%c8, %c0_39, %c0_40] : memref<9x3x6xf32, #tpu.memory_space<vmem>>, vector<1x3x6xf32>
    %51 = vector.shape_cast %50 : vector<1x3x6xf32> to vector<3x6xf32>
    %cst_41 = arith.constant dense<0.000000e+00> : vector<3x256xf32>
    %52 = tpu.matmul %51, %20, %cst_41 {dimension_numbers = #tpu.dot_dimension_numbers<[1], [0], [0], [1], [0, 0, 1, 1], [], []>} : vector<3x6xf32>, vector<6x256xf32>, vector<3x256xf32> -> vector<3x256xf32>
    %53 = arith.addf %49, %52 : vector<3x256xf32>
    %c16_i32 = arith.constant 16 : i32
    %54 = tpu.dynamic_rotate %31 by %c16_i32 dim 1 : vector<3x256xf32>, i32 -> vector<3x256xf32>
    %55 = vector.broadcast %5 : vector<1x256xf32> to vector<3x256xf32>
    %56 = arith.mulf %54, %55 : vector<3x256xf32>
    %57 = arith.addf %42, %56 : vector<3x256xf32>
    %c240_i32 = arith.constant 240 : i32
    %58 = tpu.dynamic_rotate %53 by %c240_i32 dim 1 : vector<3x256xf32>, i32 -> vector<3x256xf32>
    %59 = vector.broadcast %6 : vector<1x256xf32> to vector<3x256xf32>
    %60 = arith.mulf %58, %59 : vector<3x256xf32>
    %61 = arith.addf %57, %60 : vector<3x256xf32>
    %c0_42 = arith.constant 0 : index
    %c0_43 = arith.constant 0 : index
    %62 = vector.load %arg6[%c0_42, %c0_43] : memref<3x1xf32, #tpu.memory_space<vmem>>, vector<3x1xf32>
    %63 = vector.broadcast %62 : vector<3x1xf32> to vector<3x256xf32>
    %64 = arith.addf %61, %63 : vector<3x256xf32>
    %cst_44 = arith.constant 0.000000e+00 : f32
    %65 = vector.broadcast %cst_44 : f32 to vector<3x256xf32>
    %66 = arith.maximumf %64, %65 : vector<3x256xf32>
    %c0_45 = arith.constant 0 : index
    %c0_46 = arith.constant 0 : index
    %c0_47 = arith.constant 0 : index
    %67 = vector.load %arg7[%c0_45, %c0_46, %c0_47] : memref<1x3x256xf32, #tpu.memory_space<vmem>>, vector<1x3x256xf32>
    %68 = vector.shape_cast %67 : vector<1x3x256xf32> to vector<3x256xf32>
    %69 = vector.shape_cast %66 : vector<3x256xf32> to vector<1x3x256xf32>
    tpu.vector_store %arg7[%c0_45, %c0_46, %c0_47], %69 {strides = array<i32>} : memref<1x3x256xf32, #tpu.memory_space<vmem>>, vector<1x3x256xf32>,
    return
  }
  func.func @transform_0(%arg0: i32) -> (i32, i32, i32) {
    %c0_i32 = arith.constant 0 : i32
    %c0_i32_0 = arith.constant 0 : i32
    %c0_i32_1 = arith.constant 0 : i32
    return %arg0, %c0_i32, %c0_i32_0 : i32, i32, i32
  }
  func.func @transform_1(%arg0: i32) -> (i32, i32) {
    %c0_i32 = arith.constant 0 : i32
    %c0_i32_0 = arith.constant 0 : i32
    %c0_i32_1 = arith.constant 0 : i32
    return %c0_i32, %c0_i32_0 : i32, i32
  }
  func.func @transform_2(%arg0: i32) -> (i32, i32) {
    %c0_i32 = arith.constant 0 : i32
    %c0_i32_0 = arith.constant 0 : i32
    %c0_i32_1 = arith.constant 0 : i32
    return %c0_i32, %c0_i32_0 : i32, i32
  }
  func.func @transform_3(%arg0: i32) -> (i32, i32) {
    %c0_i32 = arith.constant 0 : i32
    %c0_i32_0 = arith.constant 0 : i32
    %c0_i32_1 = arith.constant 0 : i32
    return %c0_i32, %c0_i32_0 : i32, i32
  }
  func.func @transform_4(%arg0: i32) -> (i32, i32, i32) {
    %c0_i32 = arith.constant 0 : i32
    %c0_i32_0 = arith.constant 0 : i32
    %c0_i32_1 = arith.constant 0 : i32
    %c0_i32_2 = arith.constant 0 : i32
    return %c0_i32, %c0_i32_0, %c0_i32_1 : i32, i32, i32
  }
  func.func @transform_5(%arg0: i32) -> (i32, i32) {
    %c0_i32 = arith.constant 0 : i32
    %c0_i32_0 = arith.constant 0 : i32
    %c0_i32_1 = arith.constant 0 : i32
    return %c0_i32, %c0_i32_0 : i32, i32
  }
  func.func @transform_6(%arg0: i32) -> (i32, i32, i32) {
    %c0_i32 = arith.constant 0 : i32
    %c0_i32_0 = arith.constant 0 : i32
    %c0_i32_1 = arith.constant 0 : i32
    return %arg0, %c0_i32, %c0_i32_0 : i32, i32, i32
  }
}

</mosaic_0001>

<bundles_post_ra>
// kernel: weight_distribution_forward.3
= control target key start
LH: loop header
LB: loop body
LE: loop exit
PB: predicated region body
PF: predicated region fallthrough
CT: control target
= control target key end

     0   :  { %s1272_s21 = smov 0   ;;  %s1405_s0 = inlined_call_operand.vmem [shape: bf16[2,6,256], index: 0, kind: input, shape index: {}]   ;;  %s1406_s1 = inlined_call_operand.vmem [shape: f32[4,256], index: 1, kind: input, shape index: {}]   ;;  %s1407_s2 = inlined_call_operand.vmem [shape: f32[6,1], index: 2, kind: input, shape index: {}]   ;;  %s1408_s3 = inlined_call_operand.vmem [shape: f32[6,1], index: 3, kind: input, shape index: {}]   ;;  %s1409_s4 = inlined_call_operand.vmem [shape: f32[9,3,6], index: 4, kind: input, shape index: {}]   ;;  %s1410_s5 = inlined_call_operand.vmem [shape: f32[3,1], index: 5, kind: input, shape index: {}]   ;;  %s1411_s6 = inlined_call_operand.vmem [shape: f32[2,3,256], index: 6, kind: output, shape index: {}]  }
   0x1 LB: > { %s1145_s22 = sadd.s32 4294967295, %s1229_s21   ;;  %p1149_p0 = scmp.ge.s32.totalorder %s1229_s21, 1  ;;  %s1229_s21 = sphi %s1272_s21, %s16_s21  }
   0x2   : > { %p212_p1 = scmp.lt.s32.totalorder %s1229_s21, 3 }
   0x4   : > { %p213_p2 = pnand %p1149_p0, %p212_p1 }
   0x5   : > { %v262_v0 = vld [vmem:[%s1407_s2] sm:$0x3f] (!%p213_p2)  ;;  %v1231_v1 = vmov (!%p213_p2), 0   ;;  %v1232_v3 = vmov (!%p213_p2), 0.0   ;;  %p242_p3 = scmp.lt.s32.totalorder (!%p213_p2), %s1145_s22, 1  ;;  %vm329_vm0 = vcmask (!%p213_p2), 1045504   ;;  %v284_v18 = vlaneseq (!%p213_p2) }
   0x6   : > { %216 = sbr.rel (%p213_p2) target bundleno = 636 (0x27c), region = 44  ;;  %1222 = vset.pattern.permute.xlu0 (!%p213_p2), %v1231_v1  ;;  %v270_v2 = vld [vmem:[%s1408_s3] sm:$0x3f] (!%p213_p2)  ;;  %400 = vmatprep.mubr.f32.mxu1 (!%p213_p2), %v1232_v3  ;;  %vm325_vm1 = vcmask (!%p213_p2), 48128   ;;  %s1233_s9 = smov (!%p213_p2), 127  }
   0x7   : > { %265 = vperm.xlu0 (!%p213_p2), %1222, %v262_v0   ;;  %480 = vmatprep.mubr.f32.mxu0 (!%p213_p2), %v1232_v3  ;;  %v1157_v15 = vld [vmem:[%s1409_s4 + $0x4] sm:$0x7] (!%p213_p2)  ;;  %s1234_s10 = smov (!%p213_p2), 1   ;;  %v1075_v16 = vld [vmem:[%s1410_s5] sm:$0x7] (!%p213_p2)  ;;  %v291_v19 = vshrl.u32 (!%p213_p2), %v284_v18, 7 }
   0x8   : > { %v1169_v17 = vld [vmem:[%s1409_s4 + $0x10] sm:$0x7] (!%p213_p2)  ;;  %v1319_v20 = vand.u32 (!%p213_p2), 127, %v284_v18  ;;  %v255_v23 = vld [vmem:[%s1406_s1] ss:$4 sm:$0x3] (!%p213_p2) }
   0x9   : > { %v1321_v21 = vsub.s32 (!%p213_p2), 0, %v291_v19  ;;  %v1323_v22 = vsub.s32 (!%p213_p2), 1, %v291_v19  ;;  %v1154_v27 = vld [vmem:[%s1406_s1 + $0x1] ss:$4 sm:$0x3] (!%p213_p2)  ;;  %s1235_s12 = smov (!%p213_p2), 16  }
   0xa   : > { %vm286_vm2 = vcmp.lt.s32.totalorder (!%p213_p2), %v1319_v20, 1  ;;  %vm306_vm3 = vcmp.lt.s32.totalorder (!%p213_p2), %v1319_v20, 127  ;;  %v322_v35 = vld [vmem:[%s1409_s4] sm:$0x7] (!%p213_p2)  ;;  %v1168_v36 = vld [vmem:[%s1409_s4 + $0xc] sm:$0x7] (!%p213_p2) }
   0xb   : > { %273 = vperm.xlu0 (!%p213_p2), %1222, %v270_v2   ;;  %v293_v25 = vrot.slane (!%p213_p2), %v255_v23, %v1321_v21  ;;  %v297_v26 = vrot.slane (!%p213_p2), %v255_v23, %v1323_v22  ;;  %v313_v33 = vrot.slane (!%p213_p2), %v1154_v27, %v1321_v21  ;;  %v317_v34 = vrot.slane (!%p213_p2), %v1154_v27, %v1323_v22  ;;  %v1164_v43 = vld [vmem:[%s1409_s4 + $0x8] sm:$0x7] (!%p213_p2)  ;;  %v1176_v44 = vld [vmem:[%s1409_s4 + $0x14] sm:$0x7] (!%p213_p2)  ;;  %v1181_v45 = vld [vmem:[%s1409_s4 + $0x1c] sm:$0x7] (!%p213_p2) }
   0xc   : > { %v1180_v46 = vld [vmem:[%s1409_s4 + $0x18] sm:$0x7] (!%p213_p2)  ;;  %v1188_v47 = vld [vmem:[%s1409_s4 + $0x20] sm:$0x7] (!%p213_p2)  ;;  %s1236_s13 = smov (!%p213_p2), 112   ;;  %vm1035_vm4 = vcmp.lt.s32.totalorder (!%p213_p2), %v1319_v20, 16 }
   0xd   : > { %s1413_s22 = smov (!%p242_p3, %s1145_s22), 1  ;;  %v1155_v59 = vld [vmem:[%s1406_s1 + $0x2] ss:$4 sm:$0x3]  ;;  %vm1057_vm5 = vcmp.lt.s32.totalorder %v1319_v20, 112 }
   0xe   : > { %s1194_s27 = sshll.u32 %s1413_s22, 3  ;;  %v1042_v62 = vrot.slane %v1155_v59, %v1321_v21  ;;  %v1046_v63 = vrot.slane %v1155_v59, %v1323_v22  ;;  %v1156_v2 = vld [vmem:[%s1406_s1 + $0x3] ss:$4 sm:$0x3] }
   0xf   : > { %s246_s30 = scalar_lea.vmem %s1405_s0, %s1194_s27  ;;  %s251_s20 = scalar_lea.vmem %s1411_s6, %s1194_s27 }
  0x10   : > { %v252_v4 = vld [vmem:[%s246_s30] sm:$0x77] }
  0x11   : > { %v253_v5 = vunpack.c.l.bf16 %v252_v4  ;;  %v254_v6 = vunpack.c.h.bf16 %v252_v4 }
  0x86   : > { %v266_v7 = vpop.permute.xlu0 %265 }
  0x87   : > { %v268_v8 = vmul.f32 %v266_v7, %v253_v5  ;;  %v269_v9 = vmul.f32 %v266_v7, %v254_v6  ;;  %v1064_v5 = vrot.slane %v1156_v2, %v1321_v21  ;;  %v1068_v6 = vrot.slane %v1156_v2, %v1323_v22 }
  0x8a   : > { %v274_v10 = vpop.permute.xlu0 %273 }
  0x8b   : > { %v276_v11 = vadd.f32 %v274_v10, %v268_v8  ;;  %v277_v12 = vadd.f32 %v274_v10, %v269_v9 }
  0x8d   : > { %v1296_v13 = vmax.f32 %v276_v11, 0.0  ;;  %v279_v14 = vmax.f32 %v277_v12, 0.0 }
  0x8f   : > { %1158 = vmatprep.subr.msk.mxu1 %vm329_vm0, %v279_v14  ;;  %302 = vrot.lane.b32.xlu0 %v1296_v13, %s1233_s9 }
  0x90   : > { %280 = vrot.lane.b32.xlu1 %v1296_v13, %s1234_s10  ;;  %1159 = vmatpush1.msk.msra.mxu1 %vm329_vm0, %v1296_v13 }
  0x91   : > { %1170 = vmatprep.subr.msk.mxu1 %vm329_vm0, %v279_v14  ;;  %1160 = vmatmul.mubr.msk.f32.vlgmr.msra.gmra.mrb[0].mxu1 %vm325_vm1, %v1157_v15 }
  0x92   : > { %1171 = vmatpush1.msk.msra.mxu1 %vm329_vm0, %v1296_v13  ;;  %642 = vmatprep.mubr.f32.mxu1 %v1232_v3 }
  0x93   : > { %1078 = vperm.xlu0 %1222, %v1075_v16  }
  0x94   : > { %282 = vrot.lane.b32.xlu1 %v279_v14, %s1234_s10 }
  0x95   : > { %1172 = vmatmul.mubr.msk.f32.vlgmr.msra.gmra.mrb[2].mxu1 %vm325_vm1, %v1169_v17 }
  0x96   : > { %716 = vmatprep.mubr.f32.mxu1 %v1232_v3 }
  0x98   : > { %304 = vrot.lane.b32.xlu1 %v279_v14, %s1233_s9 }
 0x101   : > { %v303_v37 = vpop.permute.xlu0 %302 }
 0x102   : > { %v281_v24 = vpop.permute.xlu1 %280 }
 0x106   : > { %v283_v28 = vpop.permute.xlu1 %282 }
 0x107   : > { %v287_v29 = vsel %vm286_vm2, %v281_v24, %v283_v28  ;;  %v288_v30 = vsel %vm286_vm2, %v283_v28, %v281_v24 }
 0x108   : > { %v300_v31 = vmul.f32 %v293_v25, %v288_v30  ;;  %v301_v32 = vmul.f32 %v297_v26, %v287_v29 }
 0x10a   : > { %1161 = vmatprep.subr.msk.mxu0 %vm329_vm0, %v301_v32  ;;  %v305_v38 = vpop.permute.xlu1 %304  ;;  %1173 = vmatprep.subr.msk.mxu1 %vm329_vm0, %v301_v32 }
 0x10b   : > { %v307_v39 = vsel %vm306_vm3, %v303_v37, %v305_v38  ;;  %v308_v40 = vsel %vm306_vm3, %v305_v38, %v303_v37  ;;  %1162 = vmatpush1.msk.msra.mxu0 %vm329_vm0, %v300_v31  ;;  %1174 = vmatpush1.msk.msra.mxu1 %vm329_vm0, %v300_v31 }
 0x10c   : > { %v320_v41 = vmul.f32 %v313_v33, %v307_v39  ;;  %v321_v42 = vmul.f32 %v317_v34, %v308_v40  ;;  %1163 = vmatmul.mubr.msk.f32.vlgmr.msra.gmra.mrb[0].mxu0 %vm325_vm1, %v322_v35  ;;  %1175 = vmatmul.mubr.msk.f32.vlgmr.msra.gmra.mrb[2].mxu1 %vm325_vm1, %v1168_v36 }
 0x10d   : > { %562 = vmatprep.mubr.f32.mxu0 %v1232_v3  ;;  %792 = vmatprep.mubr.f32.mxu1 %v1232_v3 }
 0x10e   : > { %1165 = vmatprep.subr.msk.mxu0 %vm329_vm0, %v321_v42  ;;  %1177 = vmatprep.subr.msk.mxu1 %vm329_vm0, %v321_v42 }
 0x10f   : > { %1166 = vmatpush1.msk.msra.mxu0 %vm329_vm0, %v320_v41  ;;  %1178 = vmatpush1.msk.msra.mxu1 %vm329_vm0, %v320_v41 }
 0x110   : > { %1182 = vmatprep.subr.msk.mxu0 %vm329_vm0, %v279_v14 }
 0x112   : > { %v1079_v58 = vpop.permute.xlu0 %1078 }
 0x114   : > { %1167 = vmatmul.mubr.msk.f32.vlgmr.msra.gmra.mrb[0].mxu0 %vm325_vm1, %v1164_v43  ;;  %1179 = vmatmul.mubr.msk.f32.vlgmr.msra.gmra.mrb[2].mxu1 %vm325_vm1, %v1176_v44 }
 0x115   : > { %1183 = vmatpush1.msk.msra.mxu0 %vm329_vm0, %v1296_v13  ;;  %872 = vmatprep.mubr.f32.mxu0 %v1232_v3 }
 0x116   : > { %1185 = vmatprep.subr.msk.mxu0 %vm329_vm0, %v301_v32 }
 0x118   : > { %1184 = vmatmul.mubr.msk.f32.vlgmr.msra.gmra.mrb[2].mxu0 %vm325_vm1, %v1181_v45 }
 0x119   : > { %1186 = vmatpush1.msk.msra.mxu0 %vm329_vm0, %v300_v31  ;;  %946 = vmatprep.mubr.f32.mxu0 %v1232_v3 }
 0x11a   : > { %1189 = vmatprep.subr.msk.mxu0 %vm329_vm0, %v321_v42 }
 0x120   : > { %1187 = vmatmul.mubr.msk.f32.vlgmr.msra.gmra.mrb[2].mxu0 %vm325_vm1, %v1180_v46 }
 0x121   : > { %1190 = vmatpush1.msk.msra.mxu0 %vm329_vm0, %v320_v41  ;;  %1022 = vmatprep.mubr.f32.mxu0 %v1232_v3 }
 0x128   : > { %1191 = vmatmul.mubr.msk.f32.vlgmr.msra.gmra.mrb[2].mxu0 %vm325_vm1, %v1188_v47 }
 0x164   : > { %v402_v48 = vpop.f32.mrb[0].mxu1 }
 0x165   : > { %v404_v49 = vpop.f32.mrb[1].mxu1 }
 0x1e7   : > { %v564_v50 = vpop.f32.mrb[0].mxu0  ;;  %v794_v51 = vpop.f32.mrb[2].mxu1 }
 0x1e8   : > { %v1196_v52 = vadd.f32 %v564_v50, %v402_v48  ;;  %v566_v53 = vpop.f32.mrb[1].mxu0  ;;  %v796_v54 = vpop.f32.mrb[3].mxu1 }
 0x1e9   : > { %v1197_v55 = vadd.f32 %v566_v53, %v404_v49 }
 0x1ea   : > { %1031 = vrot.lane.b32.xlu0 %v1196_v52, %s1235_s12 }
 0x1eb   : > { %1033 = vrot.lane.b32.xlu1 %v1197_v55, %s1235_s12 }
 0x1fb   : > { %v1024_v56 = vpop.f32.mrb[2].mxu0 }
 0x1fc   : > { %v1026_v57 = vpop.f32.mrb[3].mxu0  ;;  %1053 = vrot.lane.b32.xlu1 %v1024_v56, %s1236_s13 }
 0x1fd   : > { %1055 = vrot.lane.b32.xlu0 %v1026_v57, %s1236_s13 }
 0x25c   : > { %v1032_v60 = vpop.permute.xlu0 %1031 }
 0x25d   : > { %v1034_v61 = vpop.permute.xlu1 %1033 }
 0x25e   : > { %v1036_v0 = vsel %vm1035_vm4, %v1032_v60, %v1034_v61  ;;  %v1037_v1 = vsel %vm1035_vm4, %v1034_v61, %v1032_v60 }
 0x25f   : > { %v1049_v3 = vmul.f32 %v1042_v62, %v1037_v1  ;;  %v1050_v4 = vmul.f32 %v1046_v63, %v1036_v0 }
 0x261   : > { %v1051_v11 = vadd.f32 %v1049_v3, %v794_v51  ;;  %v1052_v12 = vadd.f32 %v1050_v4, %v796_v54 }
 0x26e   : > { %v1054_v7 = vpop.permute.xlu1 %1053 }
 0x26f   : > { %v1056_v8 = vpop.permute.xlu0 %1055 }
 0x270   : > { %v1058_v9 = vsel %vm1057_vm5, %v1054_v7, %v1056_v8  ;;  %v1059_v10 = vsel %vm1057_vm5, %v1056_v8, %v1054_v7 }
 0x271   : > { %v1071_v13 = vmul.f32 %v1064_v5, %v1058_v9  ;;  %v1072_v14 = vmul.f32 %v1068_v6, %v1059_v10 }
 0x273   : > { %v1073_v15 = vadd.f32 %v1071_v13, %v1051_v11  ;;  %v1074_v16 = vadd.f32 %v1072_v14, %v1052_v12 }
 0x275   : > { %v1081_v17 = vadd.f32 %v1079_v58, %v1073_v15  ;;  %v1082_v18 = vadd.f32 %v1079_v58, %v1074_v16 }
 0x277   : > { %v1083_v19 = vmax.f32 %v1081_v17, 0.0  ;;  %v1084_v20 = vmax.f32 %v1082_v18, 0.0 }
 0x279   : > { %v1087_v21 = vcombine.low %v1083_v19, %v1084_v20 }
 0x27b   : > { %1089 = vst [vmem:[%s251_s20] sm:$0x77] %v1087_v21 }
 0x27c PF: > { %s16_s21 = sadd.s32 1, %s1229_s21  }
 0x27d   : > { %p13_p4 = scmp.ge.s32.totalorder %s16_s21, 4  }
 0x27f   :  { %15 = sbr.rel (!%p13_p4) target bundleno = 1 (0x1), region = 85 }

// kernel: weight_distribution_forward.2
= control target key start
LH: loop header
LB: loop body
LE: loop exit
PB: predicated region body
PF: predicated region fallthrough
CT: control target
= control target key end

     0   :  { %s1744_s30 = smov 0   ;;  %s1953_s0 = inlined_call_operand.vmem [shape: f32[2,7,256], index: 0, kind: input, shape index: {}]   ;;  %s1954_s1 = inlined_call_operand.vmem [shape: f32[4,256], index: 1, kind: input, shape index: {}]   ;;  %s1955_s2 = inlined_call_operand.vmem [shape: f32[6,7], index: 2, kind: input, shape index: {}]   ;;  %s1956_s3 = inlined_call_operand.vmem [shape: f32[6,1], index: 3, kind: input, shape index: {}]   ;;  %s1957_s4 = inlined_call_operand.vmem [shape: f32[6,6], index: 4, kind: input, shape index: {}]   ;;  %s1958_s5 = inlined_call_operand.vmem [shape: f32[6,1], index: 5, kind: input, shape index: {}]   ;;  %s1959_s6 = inlined_call_operand.vmem [shape: f32[9,6,6], index: 6, kind: input, shape index: {}]   ;;  %s1960_s7 = inlined_call_operand.vmem [shape: bf16[2,6,256], index: 7, kind: output, shape index: {0}]   ;;  %s1961_s8 = inlined_call_operand.vmem [shape: f32[2,6,256], index: 8, kind: output, shape index: {1}]   ;;  %s1962_s9 = inlined_call_operand.vmem [shape: f32[2,6,2], index: 9, kind: output, shape index: {2}]  }
   0x1 LB: > { %s1576_s10 = sadd.s32 4294967295, %s1686_s30   ;;  %p1580_p0 = scmp.ge.s32.totalorder %s1686_s30, 1  ;;  %s1686_s30 = sphi %s1744_s30, %s20_s30  }
   0x2   : > { %p292_p1 = scmp.lt.s32.totalorder %s1686_s30, 3 }
   0x4   : > { %p293_p2 = pnand %p1580_p0, %p292_p1 }
   0x5   : > { %p337_p3 = scmp.lt.s32.totalorder (!%p293_p2), %s1576_s10, 1  ;;  %v1688_v0 = vmov (!%p293_p2), 0.0   ;;  %v366_v1 = vld [vmem:[%s1956_s3] sm:$0x3f] (!%p293_p2)  ;;  %v1689_v2 = vmov (!%p293_p2), 0   ;;  %vm376_vm0 = vcmask (!%p293_p2), 1046528   ;;  %v563_v48 = vlaneseq (!%p293_p2) }
   0x6   : > { %296 = sbr.rel (%p293_p2) target bundleno = 1265 (0x4f1), region = 48  ;;  %447 = vmatprep.mubr.f32.mxu1 (!%p293_p2), %v1688_v0  ;;  %677 = vmatprep.mubr.f32.mxu0 (!%p293_p2), %v1688_v0  ;;  %v457_v3 = vld [vmem:[%s1958_s5] sm:$0x3f] (!%p293_p2)  ;;  %vm372_vm1 = vcmask (!%p293_p2), 56320   ;;  %vm467_vm2 = vcmask (!%p293_p2), 1045504   ;;  %vm463_vm3 = vcmask (!%p293_p2), 48128  }
   0x7   : > { %1667 = vset.pattern.permute.xlu0 (!%p293_p2), %v1689_v2  ;;  %v365_v4 = vld [vmem:[%s1955_s2] sm:$0x3f] (!%p293_p2)  ;;  %s1690_s26 = smov (!%p293_p2), 127   ;;  %s1691_s27 = smov (!%p293_p2), 1   ;;  %v1599_v34 = vld [vmem:[%s1959_s6 + $0x8] sm:$0x3f] (!%p293_p2) }
   0x8   : > { %369 = vperm.xlu0 (!%p293_p2), %1667, %v366_v1   ;;  %v456_v14 = vld [vmem:[%s1957_s4] sm:$0x3f] (!%p293_p2)  ;;  %v570_v49 = vshrl.u32 (!%p293_p2), %v563_v48, 7  ;;  %v1824_v50 = vand.u32 (!%p293_p2), 127, %v563_v48  ;;  %s1693_s11 = smov (!%p293_p2), 112   ;;  %vm1453_vm10 = vcmask (!%p293_p2), 7168  }
   0x9   : > { %v1611_v35 = vld [vmem:[%s1959_s6 + $0x20] sm:$0x3f] (!%p293_p2)  ;;  %vm1455_vm11 = vcmask (!%p293_p2), 13312  }
   0xa   : > { %v1826_v51 = vsub.s32 (!%p293_p2), 0, %v570_v49  ;;  %v1828_v52 = vsub.s32 (!%p293_p2), 1, %v570_v49  ;;  %v358_v53 = vld [vmem:[%s1954_s1] ss:$4 sm:$0x3] (!%p293_p2)  ;;  %vm565_vm4 = vcmp.lt.s32.totalorder (!%p293_p2), %v1824_v50, 1 }
   0xb   : > { %v1588_v57 = vld [vmem:[%s1954_s1 + $0x1] ss:$4 sm:$0x3] (!%p293_p2)  ;;  %vm585_vm5 = vcmp.lt.s32.totalorder (!%p293_p2), %v1824_v50, 127  ;;  %vm1312_vm6 = vcmp.lt.s32.totalorder (!%p293_p2), %v1824_v50, 16  ;;  %vm1334_vm7 = vcmp.lt.s32.totalorder (!%p293_p2), %v1824_v50, 112 }
   0xc   : > { %460 = vperm.xlu0 (!%p293_p2), %1667, %v457_v3   ;;  %v572_v55 = vrot.slane (!%p293_p2), %v358_v53, %v1826_v51  ;;  %v576_v56 = vrot.slane (!%p293_p2), %v358_v53, %v1828_v52  ;;  %v592_v63 = vrot.slane (!%p293_p2), %v1588_v57, %v1826_v51  ;;  %v596_v1 = vrot.slane (!%p293_p2), %v1588_v57, %v1828_v52  ;;  %v601_v2 = vld [vmem:[%s1959_s6] sm:$0x3f] (!%p293_p2)  ;;  %v1610_v3 = vld [vmem:[%s1959_s6 + $0x18] sm:$0x3f] (!%p293_p2) }
   0xd   : > { %s1964_s10 = smov (!%p337_p3, %s1576_s10), 1 }
   0xe   : > { %s1637_s13 = sshll.u32 %s1964_s10, 4 }
   0xf   : > { %s341_s18 = scalar_lea.vmem %s1953_s0, %s1637_s13  ;;  %s351_s25 = scalar_lea.vmem %s1961_s8, %s1637_s13 }
  0x10   : > { %v357_v5 = vld [vmem:[%s341_s18 + $0x8] sm:$0x7f]  ;;  %v356_v6 = vld [vmem:[%s341_s18] sm:$0x7f]  ;;  %s1638_s18 = sshll.u32 %s1964_s10, 3 }
  0x11   : > { %1591 = vmatprep.subr.msk.mxu1 %vm376_vm0, %v357_v5  ;;  %s346_s21 = scalar_lea.vmem %s1960_s7, %s1638_s18  ;;  %s355_s23 = scalar_lea.vmem %s1962_s9, %s1638_s18 }
  0x12   : > { %1592 = vmatpush1.msk.msra.mxu1 %vm376_vm0, %v356_v6 }
  0x13   : > { %1593 = vmatmul.mubr.msk.f32.vlgmr.msra.gmra.mrb[0].mxu1 %vm372_vm1, %v365_v4 }
  0x14   : > { %538 = vmatprep.mubr.f32.mxu1 %v1688_v0 }
  0x87   : > { %v370_v7 = vpop.permute.xlu0 %369 }
  0x8b   : > { %v461_v15 = vpop.permute.xlu0 %460 }
  0xe6   : > { %v449_v8 = vpop.f32.mrb[0].mxu1 }
  0xe7   : > { %v450_v9 = vadd.f32 %v449_v8, %v370_v7  ;;  %v451_v10 = vpop.f32.mrb[1].mxu1 }
  0xe8   : > { %v452_v11 = vadd.f32 %v451_v10, %v370_v7 }
  0xe9   : > { %v454_v13 = vmax.f32 %v450_v9, 0.0 }
  0xea   : > { %v455_v12 = vmax.f32 %v452_v11, 0.0 }
  0xec   : > { %1594 = vmatprep.subr.msk.mxu1 %vm467_vm2, %v455_v12 }
  0xed   : > { %1595 = vmatpush1.msk.msra.mxu1 %vm467_vm2, %v454_v13 }
  0xee   : > { %1596 = vmatmul.mubr.msk.f32.vlgmr.msra.gmra.mrb[2].mxu1 %vm463_vm3, %v456_v14  ;;  %v1606_v14 = vld [vmem:[%s1959_s6 + $0x10] sm:$0x3f] }
  0xef   : > { %919 = vmatprep.mubr.f32.mxu1 %v1688_v0 }
 0x1c1   : > { %v540_v16 = vpop.f32.mrb[2].mxu1 }
 0x1c2   : > { %v541_v17 = vadd.f32 %v540_v16, %v461_v15  ;;  %v542_v18 = vpop.f32.mrb[3].mxu1 }
 0x1c3   : > { %v543_v19 = vadd.f32 %v542_v18, %v461_v15  ;;  %v1618_v15 = vld [vmem:[%s1959_s6 + $0x28] sm:$0x3f] }
 0x1c4   : > { %v1597_v20 = vmul.f32 -1.442695, %v541_v17 }
 0x1c5   : > { %v1598_v21 = vmul.f32 -1.442695, %v543_v19 }
 0x1c6   : > { %1668 = vpow2.f32 %v1597_v20 }
 0x1c7   : > { %1670 = vpow2.f32 %v1598_v21 }
 0x1d0   : > { %v1669_v22 = vpop.eup %1668 }
 0x1d1   : > { %v1671_v23 = vpop.eup %1670  ;;  %v551_v24 = vadd.f32 1.0, %v1669_v22  ;;  %v1623_v22 = vld [vmem:[%s1959_s6 + $0x38] sm:$0x3f] }
 0x1d2   : > { %v552_v25 = vadd.f32 1.0, %v1671_v23 }
 0x1d3   : > { %1672 = vrcp.f32 %v551_v24 }
 0x1d4   : > { %1674 = vrcp.f32 %v552_v25 }
 0x1dd   : > { %v1673_v26 = vpop.eup %1672 }
 0x1de   : > { %v1675_v27 = vpop.eup %1674  ;;  %1427 = vst [vmem:[%s351_s25] sm:$0x3f] %v1673_v26  ;;  %v1784_v28 = vmul.f32 %v1673_v26, %v356_v6  ;;  %v1352_v29 = vsel %vm467_vm2, %v1673_v26, 0.0 }
 0x1df   : > { %1428 = vst [vmem:[%s351_s25 + $0x8] sm:$0x3f] %v1675_v27  ;;  %v1787_v30 = vmul.f32 %v1675_v27, %v357_v5  ;;  %v1353_v31 = vrot.slane %v1352_v29, 4  ;;  %v1359_v32 = vsel %vm467_vm2, %v1675_v27, 0.0 }
 0x1e0   : > { %581 = vrot.lane.b32.xlu0 %v1784_v28, %s1690_s26  ;;  %559 = vrot.lane.b32.xlu1 %v1784_v28, %s1691_s27  ;;  %v1360_v33 = vrot.slane %v1359_v32, 4 }
 0x1e1   : > { %1600 = vmatprep.subr.msk.mxu0 %vm467_vm2, %v1787_v30  ;;  %1612 = vmatprep.subr.msk.mxu1 %vm467_vm2, %v1787_v30  ;;  %v1354_v36 = vadd.f32 %v1353_v31, %v1352_v29 }
 0x1e2   : > { %1601 = vmatpush1.msk.msra.mxu0 %vm467_vm2, %v1784_v28  ;;  %1613 = vmatpush1.msk.msra.mxu1 %vm467_vm2, %v1784_v28  ;;  %v1361_v37 = vadd.f32 %v1360_v33, %v1359_v32 }
 0x1e3   : > { %v1355_v38 = vrot.slane %v1354_v36, 2  ;;  %1602 = vmatmul.mubr.msk.f32.vlgmr.msra.gmra.mrb[0].mxu0 %vm463_vm3, %v1599_v34  ;;  %1614 = vmatmul.mubr.msk.f32.vlgmr.msra.gmra.mrb[4].mxu1 %vm463_vm3, %v1611_v35 }
 0x1e4   : > { %561 = vrot.lane.b32.xlu1 %v1787_v30, %s1691_s27  ;;  %v1362_v39 = vrot.slane %v1361_v37, 2  ;;  %757 = vmatprep.mubr.f32.mxu0 %v1688_v0 }
 0x1e5   : > { %v1356_v40 = vadd.f32 %v1355_v38, %v1354_v36  ;;  %993 = vmatprep.mubr.f32.mxu1 %v1688_v0 }
 0x1e6   : > { %v1363_v41 = vadd.f32 %v1362_v39, %v1361_v37  ;;  %v1590_v39 = vld [vmem:[%s1954_s1 + $0x3] ss:$4 sm:$0x3] }
 0x1e7   : > { %v1357_v42 = vrot.slane %v1356_v40, 1 }
 0x1e8   : > { %583 = vrot.lane.b32.xlu1 %v1787_v30, %s1690_s26  ;;  %v1364_v43 = vrot.slane %v1363_v41, 1 }
 0x1e9   : > { %v1358_v44 = vadd.f32 %v1357_v42, %v1356_v40 }
 0x1ea   : > { %v1365_v45 = vadd.f32 %v1364_v43, %v1363_v41 }
 0x1eb   : > { %v1814_v46 = vmul.f32 0.16666667, %v1358_v44 }
 0x1ec   : > { %v1816_v47 = vmul.f32 0.16666667, %v1365_v45 }
 0x1ed   : > { %1369 = vrot.lane.b32.xlu0 %v1814_v46, %s1691_s27 }
 0x1ee   : > { %1371 = vrot.lane.b32.xlu1 %v1816_v47, %s1691_s27  ;;  %s1692_s27 = smov 16  }
 0x1f1   : > { %1379 = vrot.lane.b32.xlu0 %v1814_v46, %s1690_s26 }
 0x1f2   : > { %1381 = vrot.lane.b32.xlu1 %v1816_v47, %s1690_s26 }
 0x252   : > { %v560_v54 = vpop.permute.xlu1 %559  ;;  %v582_v4 = vpop.permute.xlu0 %581 }
 0x256   : > { %v562_v58 = vpop.permute.xlu1 %561 }
 0x257   : > { %v566_v59 = vsel %vm565_vm4, %v560_v54, %v562_v58  ;;  %v567_v60 = vsel %vm565_vm4, %v562_v58, %v560_v54 }
 0x258   : > { %v579_v61 = vmul.f32 %v572_v55, %v567_v60  ;;  %v580_v62 = vmul.f32 %v576_v56, %v566_v59 }
 0x25a   : > { %v584_v5 = vpop.permute.xlu1 %583  ;;  %1603 = vmatprep.subr.msk.mxu0 %vm467_vm2, %v580_v62  ;;  %1615 = vmatprep.subr.msk.mxu1 %vm467_vm2, %v580_v62 }
 0x25b   : > { %v586_v6 = vsel %vm585_vm5, %v582_v4, %v584_v5  ;;  %v587_v7 = vsel %vm585_vm5, %v584_v5, %v582_v4  ;;  %1604 = vmatpush1.msk.msra.mxu0 %vm467_vm2, %v579_v61  ;;  %1616 = vmatpush1.msk.msra.mxu1 %vm467_vm2, %v579_v61 }
 0x25c   : > { %v599_v8 = vmul.f32 %v592_v63, %v586_v6  ;;  %v600_v9 = vmul.f32 %v596_v1, %v587_v7  ;;  %1605 = vmatmul.mubr.msk.f32.vlgmr.msra.gmra.mrb[0].mxu0 %vm463_vm3, %v601_v2  ;;  %1617 = vmatmul.mubr.msk.f32.vlgmr.msra.gmra.mrb[4].mxu1 %vm463_vm3, %v1610_v3 }
 0x25d   : > { %839 = vmatprep.mubr.f32.mxu0 %v1688_v0  ;;  %1069 = vmatprep.mubr.f32.mxu1 %v1688_v0 }
 0x25e   : > { %1607 = vmatprep.subr.msk.mxu0 %vm467_vm2, %v600_v9  ;;  %1619 = vmatprep.subr.msk.mxu1 %vm467_vm2, %v600_v9 }
 0x25f   : > { %v1370_v10 = vpop.permute.xlu0 %1369  ;;  %1608 = vmatpush1.msk.msra.mxu0 %vm467_vm2, %v599_v8  ;;  %1620 = vmatpush1.msk.msra.mxu1 %vm467_vm2, %v599_v8 }
 0x260   : > { %v1372_v11 = vpop.permute.xlu1 %1371  ;;  %1624 = vmatprep.subr.msk.mxu0 %vm467_vm2, %v1787_v30  ;;  %v1630_v30 = vld [vmem:[%s1959_s6 + $0x40] sm:$0x3f] }
 0x261   : > { %v1373_v12 = vsel %vm565_vm4, %v1370_v10, %v1372_v11  ;;  %v1374_v13 = vsel %vm565_vm4, %v1372_v11, %v1370_v10 }
 0x262   : > { %v1375_v16 = vmul.f32 %v1374_v13, %v572_v55  ;;  %v1376_v17 = vmul.f32 %v1373_v12, %v576_v56 }
 0x263   : > { %v1380_v18 = vpop.permute.xlu0 %1379 }
 0x264   : > { %v1382_v19 = vpop.permute.xlu1 %1381  ;;  %1609 = vmatmul.mubr.msk.f32.vlgmr.msra.gmra.mrb[0].mxu0 %vm463_vm3, %v1606_v14  ;;  %1621 = vmatmul.mubr.msk.f32.vlgmr.msra.gmra.mrb[4].mxu1 %vm463_vm3, %v1618_v15  ;;  %v1377_v23 = vadd.f32 %v1375_v16, %v1814_v46  ;;  %v1378_v24 = vadd.f32 %v1376_v17, %v1816_v47  ;;  %v1341_v46 = vrot.slane %v1590_v39, %v1826_v51 }
 0x265   : > { %v1383_v20 = vsel %vm585_vm5, %v1380_v18, %v1382_v19  ;;  %v1384_v21 = vsel %vm585_vm5, %v1382_v19, %v1380_v18  ;;  %1625 = vmatpush1.msk.msra.mxu0 %vm467_vm2, %v1784_v28  ;;  %1149 = vmatprep.mubr.f32.mxu0 %v1688_v0  ;;  %v1622_v28 = vld [vmem:[%s1959_s6 + $0x30] sm:$0x3f]  ;;  %v1345_v47 = vrot.slane %v1590_v39, %v1828_v52 }
 0x266   : > { %v1385_v25 = vmul.f32 %v1383_v20, %v592_v63  ;;  %v1386_v26 = vmul.f32 %v1384_v21, %v596_v1  ;;  %1627 = vmatprep.subr.msk.mxu0 %vm467_vm2, %v580_v62 }
 0x268   : > { %1626 = vmatmul.mubr.msk.f32.vlgmr.msra.gmra.mrb[2].mxu0 %vm463_vm3, %v1623_v22  ;;  %v1388_v27 = vadd.f32 %v1386_v26, %v1378_v24  ;;  %v1387_v29 = vadd.f32 %v1385_v25, %v1377_v23 }
 0x269   : > { %1628 = vmatpush1.msk.msra.mxu0 %vm467_vm2, %v579_v61  ;;  %1223 = vmatprep.mubr.f32.mxu0 %v1688_v0 }
 0x26a   : > { %1631 = vmatprep.subr.msk.mxu0 %vm467_vm2, %v600_v9  ;;  %1391 = vrot.lane.b32.xlu1 %v1388_v27, %s1692_s27 }
 0x26b   : > { %1389 = vrot.lane.b32.xlu0 %v1387_v29, %s1692_s27 }
 0x26e   : > { %1401 = vrot.lane.b32.xlu1 %v1388_v27, %s1693_s11 }
 0x26f   : > { %1399 = vrot.lane.b32.xlu0 %v1387_v29, %s1693_s11 }
 0x270   : > { %1629 = vmatmul.mubr.msk.f32.vlgmr.msra.gmra.mrb[2].mxu0 %vm463_vm3, %v1622_v28 }
 0x271   : > { %1632 = vmatpush1.msk.msra.mxu0 %vm467_vm2, %v599_v8  ;;  %1299 = vmatprep.mubr.f32.mxu0 %v1688_v0  ;;  %v1589_v0 = vld [vmem:[%s1954_s1 + $0x2] ss:$4 sm:$0x3] }
 0x272   : > { %v1319_v40 = vrot.slane %v1589_v0, %v1826_v51  ;;  %v1323_v43 = vrot.slane %v1589_v0, %v1828_v52 }
 0x278   : > { %1633 = vmatmul.mubr.msk.f32.vlgmr.msra.gmra.mrb[2].mxu0 %vm463_vm3, %v1630_v30 }
 0x2dc   : > { %v1392_v37 = vpop.permute.xlu1 %1391 }
 0x2dd   : > { %v1390_v38 = vpop.permute.xlu0 %1389 }
 0x2de   : > { %v1394_v44 = vsel %vm1312_vm6, %v1392_v37, %v1390_v38  ;;  %v1393_v45 = vsel %vm1312_vm6, %v1390_v38, %v1392_v37 }
 0x2df   : > { %v1395_v49 = vmul.f32 %v1394_v44, %v1319_v40  ;;  %v1396_v54 = vmul.f32 %v1393_v45, %v1323_v43 }
 0x2e0   : > { %v1402_v41 = vpop.permute.xlu1 %1401 }
 0x2e1   : > { %v1400_v42 = vpop.permute.xlu0 %1399  ;;  %v1397_v57 = vadd.f32 %v1395_v49, %v1387_v29  ;;  %v1398_v58 = vadd.f32 %v1396_v54, %v1388_v27 }
 0x2e2   : > { %v1403_v48 = vsel %vm1334_vm7, %v1400_v42, %v1402_v41  ;;  %v1404_v53 = vsel %vm1334_vm7, %v1402_v41, %v1400_v42 }
 0x2e3   : > { %v1405_v55 = vmul.f32 %v1403_v48, %v1341_v46  ;;  %v1406_v56 = vmul.f32 %v1404_v53, %v1345_v47 }
 0x2e5   : > { %v1407_v59 = vadd.f32 %v1405_v55, %v1397_v57  ;;  %v1408_v60 = vadd.f32 %v1406_v56, %v1398_v58 }
 0x2e7   : > { %v1409_v61 = vmul.f32 0.11111111, %v1407_v59  ;;  %v1410_v62 = vmul.f32 0.11111111, %v1408_v60 }
 0x2e9   : > { %vm1411_vm8 = vcmp.eq.f32.partialorder %v1409_v61, 0.0  ;;  %vm1412_vm9 = vcmp.eq.f32.partialorder %v1410_v62, 0.0 }
 0x2ea   : > { %v1413_v63 = vsel %vm1411_vm8, 1.0, %v1409_v61  ;;  %v1414_v52 = vsel %vm1412_vm9, 1.0, %v1410_v62 }
 0x2eb   : > { %1676 = vrcp.f32 %v1413_v63 }
 0x2ec   : > { %1678 = vrcp.f32 %v1414_v52 }
 0x2f5   : > { %v1677_v8 = vpop.eup %1676 }
 0x2f6   : > { %v1679_v10 = vpop.eup %1678  ;;  %v1420_v17 = vrot.slane %v1677_v8, %v1826_v51 }
 0x2f7   : > { %v1424_v18 = vrot.slane %v1679_v10, %v1826_v51 }
 0x337   : > { %v841_v31 = vpop.f32.mrb[0].mxu0  ;;  %v1071_v32 = vpop.f32.mrb[4].mxu1 }
 0x338   : > { %1308 = vrot.lane.b32.xlu0 %v841_v31, %s1692_s27  ;;  %v843_v33 = vpop.f32.mrb[1].mxu0  ;;  %v1073_v34 = vpop.f32.mrb[5].mxu1 }
 0x339   : > { %1310 = vrot.lane.b32.xlu1 %v843_v33, %s1692_s27 }
 0x34b   : > { %v1301_v35 = vpop.f32.mrb[2].mxu0 }
 0x34c   : > { %1330 = vrot.lane.b32.xlu0 %v1301_v35, %s1693_s11  ;;  %v1303_v36 = vpop.f32.mrb[3].mxu0 }
 0x34d   : > { %1332 = vrot.lane.b32.xlu1 %v1303_v36, %s1693_s11 }
 0x3aa   : > { %v1309_v1 = vpop.permute.xlu0 %1308 }
 0x3ab   : > { %v1311_v2 = vpop.permute.xlu1 %1310 }
 0x3ac   : > { %v1313_v3 = vsel %vm1312_vm6, %v1309_v1, %v1311_v2  ;;  %v1314_v4 = vsel %vm1312_vm6, %v1311_v2, %v1309_v1 }
 0x3ad   : > { %v1326_v5 = vmul.f32 %v1319_v40, %v1314_v4  ;;  %v1327_v6 = vmul.f32 %v1323_v43, %v1313_v3 }
 0x3af   : > { %v1328_v13 = vadd.f32 %v1326_v5, %v1071_v32  ;;  %v1329_v14 = vadd.f32 %v1327_v6, %v1073_v34 }
 0x3be   : > { %v1331_v7 = vpop.permute.xlu0 %1330 }
 0x3bf   : > { %v1333_v9 = vpop.permute.xlu1 %1332 }
 0x3c0   : > { %v1335_v11 = vsel %vm1334_vm7, %v1331_v7, %v1333_v9  ;;  %v1336_v12 = vsel %vm1334_vm7, %v1333_v9, %v1331_v7 }
 0x3c1   : > { %v1348_v15 = vmul.f32 %v1341_v46, %v1335_v11  ;;  %v1349_v16 = vmul.f32 %v1345_v47, %v1336_v12 }
 0x3c3   : > { %v1350_v19 = vadd.f32 %v1348_v15, %v1328_v13  ;;  %v1351_v20 = vadd.f32 %v1349_v16, %v1329_v14 }
 0x3c5   : > { %v1425_v21 = vmul.f32 %v1420_v17, %v1350_v19  ;;  %v1426_v22 = vmul.f32 %v1424_v18, %v1351_v20 }
 0x3c7   : > { %v1640_v23 = vpack.c.bf16 %v1426_v22, %v1425_v21  ;;  %v1438_v50 = vsel %vm467_vm2, %v1425_v21, 0.0  ;;  %v1439_v24 = vsel %vm467_vm2, %v1426_v22, 0.0 }
 0x3c8   : > { %v1440_v25 = vadd.f32 %v1439_v24, %v1438_v50 }
 0x3c9   : > { %1437 = vst [vmem:[%s346_s21] sm:$0x77] %v1640_v23 }
 0x3ca   : > { %1441 = vadd.xlane.f32.xlu0 %v1440_v25 }
 0x457   : > { %v1442_v26 = vpop.xlane.xlu0 %1441 }
 0x458   : > { %v1443_v27 = vmul.f32 0.00390625, %v1442_v26 }
 0x45a   : > { %v1444_v29 = vsub.f32 %v1425_v21, %v1443_v27  ;;  %v1445_v51 = vsub.f32 %v1426_v22, %v1443_v27 }
 0x45c   : > { %v1446_v28 = vmul.f32 %v1444_v29, %v1444_v29  ;;  %v1447_v30 = vmul.f32 %v1445_v51, %v1445_v51 }
 0x45e   : > { %v1448_v31 = vsel %vm467_vm2, %v1446_v28, 0.0  ;;  %v1449_v32 = vsel %vm467_vm2, %v1447_v30, 0.0 }
 0x45f   : > { %v1450_v33 = vadd.f32 %v1449_v32, %v1448_v31 }
 0x461   : > { %1451 = vadd.xlane.f32.xlu1 %v1450_v33 }
 0x4ee   : > { %v1452_v34 = vpop.xlane.xlu1 %1451 }
 0x4ef   : > { %v1454_v35 = vsel %vm1453_vm10, %v1443_v27, %v1452_v34 }
 0x4f0   : > { %1456 = vst.msk [vmem:[%s355_s23] sm:$0x3f] %vm1455_vm11, %v1454_v35 }
 0x4f1 PF: > { %s20_s30 = sadd.s32 1, %s1686_s30  }
 0x4f2   : > { %p17_p4 = scmp.ge.s32.totalorder %s20_s30, 4  }
 0x4f4   :  { %19 = sbr.rel (!%p17_p4) target bundleno = 1 (0x1), region = 113 }

</bundles_post_ra>
